<compile_context>
chip_gen: v5e
topology: v5e:2x2
jax: 0.10.0
libtpu: 0.0.40
codegen_flags: <defaults>
</compile_context>

<pallas_src>
import functools
import numpy as np
import jax
import jax.numpy as jnp
from jax import lax
from jax.experimental import pallas as pl
from jax.experimental.pallas import tpu as pltpu

NEG_INF = -10000000.0  # matches torch.tensor(-10000000.0) in CausalScaledDotAttention


def _round_up(x, m):
    return ((x + m - 1) // m) * m


def _pad_to(x, shape):
    """Zero-pad x up to `shape` (trailing pads only)."""
    pads = [(0, t - s) for s, t in zip(x.shape, shape)]
    return jnp.pad(x, pads)


def _pad_last_lanes(x, width):
    """Zero-pad the last (lane) dim of an in-kernel value up to `width`."""
    pad = width - x.shape[-1]
    if pad == 0:
        return x
    return jnp.concatenate([x, jnp.zeros(x.shape[:-1] + (pad,), x.dtype)], axis=-1)


def _softmax_last(s):
    """Numerically-stable softmax over the last axis (f32)."""
    m = jnp.max(s, axis=-1, keepdims=True)
    e = jnp.exp(s - m)
    d = jnp.sum(e, axis=-1, keepdims=True)
    r = pl.reciprocal(d, approx=True)   # EUP vrcp (otherwise-idle slot) ...
    r = r * (2.0 - d * r)               # ... + one Newton step -> ~f32 accuracy
    return e * r


def decoder_kernel(embed_ref, ann_ref,
                   w_qkv_s_ref, b_qkv_s_ref,       # fused self-attn QKV (128-lane stripes)
                   w_q_e_ref, b_q_e_ref,           # encoder-attn query
                   w_kv_e_ref, b_kv_e_ref,         # fused encoder K/V (all layers, 128-lane stripes)
                   w_mlp_ref, b_mlp_ref,
                   w_out_ref, b_out_ref,
                   out_ref, enc_attn_ref, self_attn_ref,
                   *, scale):
    Bb, T, Hp = embed_ref.shape
    S = ann_ref.shape[1]
    L = w_qkv_s_ref.shape[0]
    TSp = enc_attn_ref.shape[2]
    TTp = self_attn_ref.shape[2]

    x = embed_ref[...]                              # (Bb, T, Hp) padded hidden space
    ann = ann_ref[...]                              # (Bb, S, Hp)

    # causal mask: position t may attend to positions <= t
    row = lax.broadcasted_iota(jnp.int32, (T, T), 0)
    col = lax.broadcasted_iota(jnp.int32, (T, T), 1)
    causal = (col <= row)[None, :, :]               # (1, T, T) -> broadcast over batch

    # Encoder K/V for ALL layers in one fused matmul, hoisted out of the layer loop
    # (annotations are layer-invariant). Per-layer K/V occupy 128-lane-aligned stripes.
    kv_e_all = (jnp.einsum('bsh,hk->bsk', ann, w_kv_e_ref[...],
                           preferred_element_type=jnp.float32)
                + b_kv_e_ref[...])                  # (Bb, S, 2*L*Hp)

    self_maps = []
    enc_maps = []
    for i in range(L):  # num_layers is static -> unrolled
        # ---- causal scaled-dot self-attention (fused QKV projection) ----
        qkv = (jnp.einsum('bth,hk->btk', x, w_qkv_s_ref[i],
                          preferred_element_type=jnp.float32)
               + b_qkv_s_ref[i])                    # (Bb, T, 3*Hp)
        q = qkv[:, :, 0:Hp]
        k = qkv[:, :, Hp:2 * Hp]
        v = qkv[:, :, 2 * Hp:3 * Hp]
        s = jnp.einsum('bqh,bkh->bqk', q, k,
                       preferred_element_type=jnp.float32) * scale
        s = jnp.where(causal, s, NEG_INF)
        attn_s = _softmax_last(s)                   # (Bb, T, T)
        self_maps.append(_pad_last_lanes(attn_s.reshape(Bb, T * T), TTp))
        x = x + jnp.einsum('bqk,bkh->bqh', attn_s, v,
                           preferred_element_type=jnp.float32)    # residual

        # ---- scaled-dot encoder attention ----
        qe = (jnp.einsum('bth,hk->btk', x, w_q_e_ref[i],
                         preferred_element_type=jnp.float32)
              + b_q_e_ref[i])                       # (Bb, T, Hp)
        ke = kv_e_all[:, :, (2 * i) * Hp:(2 * i + 1) * Hp]
        ve = kv_e_all[:, :, (2 * i + 1) * Hp:(2 * i + 2) * Hp]
        se = jnp.einsum('bqh,bkh->bqk', qe, ke,
                        preferred_element_type=jnp.float32) * scale
        attn_e = _softmax_last(se)                  # (Bb, T, S)
        enc_maps.append(_pad_last_lanes(attn_e.reshape(Bb, T * S), TSp))
        x = x + jnp.einsum('bqk,bkh->bqh', attn_e, ve,
                           preferred_element_type=jnp.float32)    # residual

        # ---- attention MLP (Linear + ReLU), residual ----
        h = (jnp.einsum('bth,hk->btk', x, w_mlp_ref[i],
                        preferred_element_type=jnp.float32)
             + b_mlp_ref[i])
        x = x + jnp.maximum(h, 0.0)

    # ---- output projection (vocab padded to lane-dense width) ----
    # TODO(synk): for NMT-scale vocab sizes, tile w_out / the logits along a second
    # grid axis (512-2048 lane chunks) instead of holding the full (Hp, Vp) in VMEM.
    out_ref[...] = (jnp.einsum('bth,hv->btv', x, w_out_ref[...],
                               preferred_element_type=jnp.float32)
                    + b_out_ref[...])               # (Bb, T, Vp)

    # Single lane-dense stores of the attention maps (all layers at once).
    enc_attn_ref[...] = jnp.stack(enc_maps, axis=1)     # (Bb, L, TSp)
    self_attn_ref[...] = jnp.stack(self_maps, axis=1)   # (Bb, L, TTp)


def _vmem_limit_bytes():
    """~75% of physical per-core VMEM.  Never 100% (on v7x physical is only 64 MiB
    and the compiler needs headroom for double buffers / internal scratch)."""
    cap = 64 * 1024 * 1024                           # conservative default (v7x physical)
    try:                                             # narrow HW query only; never wraps the kernel
        cap = int(pltpu.get_tpu_info().vmem_capacity_bytes)
    except Exception:
        pass
    return max(32 * 1024 * 1024, min(cap * 3 // 4, 100 * 1024 * 1024))


def _pick_batch_block(B, T, S, Hp, Vp, TTp, TSp, L, vmem_limit_bytes):
    """Largest divisor of B whose grid-varying blocks fit the VMEM budget,
    preferring >= 2 grid steps so the 'parallel' axis can shard across
    TensorCores on v7x (grid-step overhead ~0.35us is negligible elsewhere)."""
    f32 = 4
    # Weights are grid-invariant but still double-buffered by default.
    weight_elems = (L * Hp * 3 * Hp + L * 3 * Hp        # fused self-attn QKV
                    + L * Hp * Hp + L * Hp              # encoder-attn query
                    + Hp * 2 * L * Hp + 2 * L * Hp      # fused encoder K/V (all layers)
                    + L * Hp * Hp + L * Hp              # MLP
                    + Hp * Vp + Vp)                     # output projection
    weight_bytes = 2 * f32 * weight_elems

    def block_bytes(bb):
        io = bb * (T * Hp + S * Hp + T * Vp + L * TTp + L * TSp)   # grid-varying blocks
        tmp = bb * (S * 2 * L * Hp + T * 3 * Hp)                   # largest in-kernel temps
        return 2 * f32 * io + f32 * tmp

    budget = max(int(vmem_limit_bytes * 0.6) - weight_bytes, 0)
    divisors = [d for d in range(1, B + 1) if B % d == 0]
    fitting = [d for d in divisors if block_bytes(d) <= budget] or [1]
    multi_step = [d for d in fitting if B // d >= 2]
    return max(multi_step) if multi_step else max(fitting)


def transformer_decoder_forward(inputs, annotations, params):
    """inputs: (B, T) int32 token ids; annotations: (B, S, H) float32."""
    # TODO(synk): embedding gather (data-dependent row gather) kept as plain-JAX glue.
    emb = params["embedding"][inputs]               # (B, T, H)
    B, T, H = emb.shape
    S = annotations.shape[1]
    L = params["wq_s"].shape[0]
    V = params["w_out"].shape[1]

    Hp = _round_up(H, 128)                          # 128-lane hidden space
    Vp = _round_up(V, 128)                          # lane-dense logits width
    TTp = _round_up(T * T, 128)                     # lane-dense self-attn slab
    TSp = _round_up(T * S, 128)                     # lane-dense enc-attn slab

    # ---- parameter fusion / zero padding (layout only, numerics unchanged) ----
    emb_p = _pad_to(emb, (B, T, Hp))
    ann_p = _pad_to(annotations, (B, S, Hp))

    wq_s = _pad_to(params["wq_s"], (L, Hp, Hp))
    wk_s = _pad_to(params["wk_s"], (L, Hp, Hp))
    wv_s = _pad_to(params["wv_s"], (L, Hp, Hp))
    w_qkv_s = jnp.concatenate([wq_s, wk_s, wv_s], axis=-1)          # (L, Hp, 3*Hp)
    b_qkv_s = jnp.concatenate([_pad_to(params["bq_s"], (L, 1, Hp)),
                               _pad_to(params["bk_s"], (L, 1, Hp)),
                               _pad_to(params["bv_s"], (L, 1, Hp))], axis=-1)

    w_q_e = _pad_to(params["wq_e"], (L, Hp, Hp))
    b_q_e = _pad_to(params["bq_e"], (L, 1, Hp))

    wk_e = _pad_to(params["wk_e"], (L, Hp, Hp))
    wv_e = _pad_to(params["wv_e"], (L, Hp, Hp))
    bk_e = _pad_to(params["bk_e"], (L, 1, Hp))
    bv_e = _pad_to(params["bv_e"], (L, 1, Hp))
    w_kv_e = jnp.concatenate(
        [jnp.concatenate([wk_e[i], wv_e[i]], axis=-1) for i in range(L)], axis=-1)  # (Hp, 2*L*Hp)
    b_kv_e = jnp.concatenate(
        [jnp.concatenate([bk_e[i], bv_e[i]], axis=-1) for i in range(L)], axis=-1)  # (1, 2*L*Hp)

    w_mlp = _pad_to(params["w_mlp"], (L, Hp, Hp))
    b_mlp = _pad_to(params["b_mlp"], (L, 1, Hp))
    w_out_p = _pad_to(params["w_out"], (Hp, Vp))
    b_out_p = _pad_to(params["b_out"], (1, Vp))

    vmem_limit = _vmem_limit_bytes()
    b_blk = _pick_batch_block(B, T, S, Hp, Vp, TTp, TSp, L, vmem_limit)
    nb = B // b_blk

    kernel = functools.partial(decoder_kernel, scale=float(H) ** -0.5)

    in_specs = [
        pl.BlockSpec((b_blk, T, Hp), lambda b: (b, 0, 0)),
        pl.BlockSpec((b_blk, S, Hp), lambda b: (b, 0, 0)),
        pl.BlockSpec((L, Hp, 3 * Hp), lambda b: (0, 0, 0)),
        pl.BlockSpec((L, 1, 3 * Hp), lambda b: (0, 0, 0)),
        pl.BlockSpec((L, Hp, Hp), lambda b: (0, 0, 0)),
        pl.BlockSpec((L, 1, Hp), lambda b: (0, 0, 0)),
        pl.BlockSpec((Hp, 2 * L * Hp), lambda b: (0, 0)),
        pl.BlockSpec((1, 2 * L * Hp), lambda b: (0, 0)),
        pl.BlockSpec((L, Hp, Hp), lambda b: (0, 0, 0)),
        pl.BlockSpec((L, 1, Hp), lambda b: (0, 0, 0)),
        pl.BlockSpec((Hp, Vp), lambda b: (0, 0)),
        pl.BlockSpec((1, Vp), lambda b: (0, 0)),
    ]
    out_shapes = [
        jax.ShapeDtypeStruct((B, T, Vp), jnp.float32),
        jax.ShapeDtypeStruct((B, L, TSp), jnp.float32),   # enc-attn lane-dense slab
        jax.ShapeDtypeStruct((B, L, TTp), jnp.float32),   # self-attn lane-dense slab
    ]
    out_specs = [
        pl.BlockSpec((b_blk, T, Vp), lambda b: (b, 0, 0)),
        pl.BlockSpec((b_blk, L, TSp), lambda b: (b, 0, 0)),
        pl.BlockSpec((b_blk, L, TTp), lambda b: (b, 0, 0)),
    ]

    fn = pl.pallas_call(
        kernel,
        out_shape=out_shapes,
        grid=(nb,),
        in_specs=in_specs,
        out_specs=out_specs,
        compiler_params=pltpu.CompilerParams(
            dimension_semantics=("parallel",),
            vmem_limit_bytes=vmem_limit,
        ),
    )
    out_p, enc_p, self_p = fn(emb_p, ann_p,
                              w_qkv_s, b_qkv_s,
                              w_q_e, b_q_e,
                              w_kv_e, b_kv_e,
                              w_mlp, b_mlp,
                              w_out_p, b_out_p)

    out = out_p[:, :, :V]
    enc_attn = jnp.transpose(enc_p[:, :, :T * S].reshape(B, L, T, S), (1, 0, 2, 3))
    self_attn = jnp.transpose(self_p[:, :, :T * T].reshape(B, L, T, T), (1, 0, 2, 3))
    return out, (enc_attn, self_attn)


# ---------------- pure-JAX reference (for correctness check) ----------------
def reference_forward(inputs, annotations, params):
    emb = params["embedding"][inputs]
    B, T, H = emb.shape
    L = params["wq_s"].shape[0]
    scale = jnp.float32(H) ** -0.5

    x = emb
    enc_list, self_list = [], []
    row = np.arange(T)[:, None]
    col = np.arange(T)[None, :]
    causal = jnp.asarray(col <= row)
    for i in range(L):
        q = x @ params["wq_s"][i] + params["bq_s"][i]
        k = x @ params["wk_s"][i] + params["bk_s"][i]
        v = x @ params["wv_s"][i] + params["bv_s"][i]
        sc = jnp.einsum("bth,bsh->bts", q, k) * scale
        sc = jnp.where(causal, sc, NEG_INF)
        a_s = jax.nn.softmax(sc, axis=-1)
        self_list.append(a_s)
        x = x + jnp.einsum("bts,bsh->bth", a_s, v)

        qe = x @ params["wq_e"][i] + params["bq_e"][i]
        ke = annotations @ params["wk_e"][i] + params["bk_e"][i]
        ve = annotations @ params["wv_e"][i] + params["bv_e"][i]
        se = jnp.einsum("bth,bsh->bts", qe, ke) * scale
        a_e = jax.nn.softmax(se, axis=-1)
        enc_list.append(a_e)
        x = x + jnp.einsum("bts,bsh->bth", a_e, ve)

        h = jnp.maximum(x @ params["w_mlp"][i] + params["b_mlp"][i], 0.0)
        x = x + h

    out = x @ params["w_out"] + params["b_out"]
    return out, (jnp.stack(enc_list), jnp.stack(self_list))


def make_params(key, vocab_size, hidden_size, num_layers):
    ks = jax.random.split(key, 18)
    H, V, L = hidden_size, vocab_size, num_layers
    s = 0.1
    return {
        "embedding": jax.random.normal(ks[0], (V, H), jnp.float32) * s,
        "wq_s": jax.random.normal(ks[1], (L, H, H), jnp.float32) * s,
        "wk_s": jax.random.normal(ks[2], (L, H, H), jnp.float32) * s,
        "wv_s": jax.random.normal(ks[3], (L, H, H), jnp.float32) * s,
        "bq_s": jax.random.normal(ks[4], (L, 1, H), jnp.float32) * s,
        "bk_s": jax.random.normal(ks[5], (L, 1, H), jnp.float32) * s,
        "bv_s": jax.random.normal(ks[6], (L, 1, H), jnp.float32) * s,
        "wq_e": jax.random.normal(ks[7], (L, H, H), jnp.float32) * s,
        "wk_e": jax.random.normal(ks[8], (L, H, H), jnp.float32) * s,
        "wv_e": jax.random.normal(ks[9], (L, H, H), jnp.float32) * s,
        "bq_e": jax.random.normal(ks[10], (L, 1, H), jnp.float32) * s,
        "bk_e": jax.random.normal(ks[11], (L, 1, H), jnp.float32) * s,
        "bv_e": jax.random.normal(ks[12], (L, 1, H), jnp.float32) * s,
        "w_mlp": jax.random.normal(ks[13], (L, H, H), jnp.float32) * s,
        "b_mlp": jax.random.normal(ks[14], (L, 1, H), jnp.float32) * s,
        "w_out": jax.random.normal(ks[15], (H, V), jnp.float32) * s,
        "b_out": jax.random.normal(ks[16], (1, V), jnp.float32) * s,
    }


if __name__ == "__main__":
    B, T, S, H, V, L = 2, 8, 8, 32, 20, 2

    key = jax.random.PRNGKey(0)
    k_tok, k_ann, k_par = jax.random.split(key, 3)
    inputs = jax.random.randint(k_tok, (B, T), 0, V, dtype=jnp.int32)
    annotations = jax.random.normal(k_ann, (B, S, H), jnp.float32)
    params = make_params(k_par, V, H, L)

    out, (enc_attn, self_attn) = transformer_decoder_forward(inputs, annotations, params)
    jax.block_until_ready(out)
    jax.block_until_ready(enc_attn)
    jax.block_until_ready(self_attn)

    ref_out, (ref_enc, ref_self) = reference_forward(inputs, annotations, params)
    np.testing.assert_allclose(np.asarray(out), np.asarray(ref_out), rtol=1e-4, atol=1e-4)
    np.testing.assert_allclose(np.asarray(enc_attn), np.asarray(ref_enc), rtol=1e-4, atol=1e-4)
    np.testing.assert_allclose(np.asarray(self_attn), np.asarray(ref_self), rtol=1e-4, atol=1e-4)

    assert out.shape == (B, T, V)
    assert enc_attn.shape == (L, B, T, S)
    assert self_attn.shape == (L, B, T, T)
    print("KERNEL_OK")
</pallas_src>

<mosaic_0001>
module attributes {stable_mosaic.version = 11 : i64} {
  func.func @decoder_kernel(%arg0: i32, %arg1: memref<1x8x128xf32, #tpu.memory_space<vmem>>, %arg2: memref<1x8x128xf32, #tpu.memory_space<vmem>>, %arg3: memref<2x128x384xf32, #tpu.memory_space<vmem>>, %arg4: memref<2x1x384xf32, #tpu.memory_space<vmem>>, %arg5: memref<2x128x128xf32, #tpu.memory_space<vmem>>, %arg6: memref<2x1x128xf32, #tpu.memory_space<vmem>>, %arg7: memref<128x512xf32, #tpu.memory_space<vmem>>, %arg8: memref<1x512xf32, #tpu.memory_space<vmem>>, %arg9: memref<2x128x128xf32, #tpu.memory_space<vmem>>, %arg10: memref<2x1x128xf32, #tpu.memory_space<vmem>>, %arg11: memref<128x128xf32, #tpu.memory_space<vmem>>, %arg12: memref<1x128xf32, #tpu.memory_space<vmem>>, %arg13: memref<1x8x128xf32, #tpu.memory_space<vmem>>, %arg14: memref<1x2x128xf32, #tpu.memory_space<vmem>>, %arg15: memref<1x2x128xf32, #tpu.memory_space<vmem>>) attributes {dimension_semantics = [#tpu.dimension_semantics<parallel>], iteration_bounds = array<i64: 2>, scalar_prefetch = 0 : i64, scratch_operands = 0 : i64, tpu.core_type = #tpu.core_type<tc>, window_params = [{transform_indices = @transform_0, window_bounds = array<i64: 1, 8, 128>}, {transform_indices = @transform_1, window_bounds = array<i64: 1, 8, 128>}, {pipeline_mode = #tpu.pipeline_mode<synchronous>, transform_indices = @transform_2, window_bounds = array<i64: 2, 128, 384>}, {pipeline_mode = #tpu.pipeline_mode<synchronous>, transform_indices = @transform_3, window_bounds = array<i64: 2, 1, 384>}, {pipeline_mode = #tpu.pipeline_mode<synchronous>, transform_indices = @transform_4, window_bounds = array<i64: 2, 128, 128>}, {pipeline_mode = #tpu.pipeline_mode<synchronous>, transform_indices = @transform_5, window_bounds = array<i64: 2, 1, 128>}, {pipeline_mode = #tpu.pipeline_mode<synchronous>, transform_indices = @transform_6, window_bounds = array<i64: 128, 512>}, {pipeline_mode = #tpu.pipeline_mode<synchronous>, transform_indices = @transform_7, window_bounds = array<i64: 1, 512>}, {pipeline_mode = #tpu.pipeline_mode<synchronous>, transform_indices = @transform_8, window_bounds = array<i64: 2, 128, 128>}, {pipeline_mode = #tpu.pipeline_mode<synchronous>, transform_indices = @transform_9, window_bounds = array<i64: 2, 1, 128>}, {pipeline_mode = #tpu.pipeline_mode<synchronous>, transform_indices = @transform_10, window_bounds = array<i64: 128, 128>}, {pipeline_mode = #tpu.pipeline_mode<synchronous>, transform_indices = @transform_11, window_bounds = array<i64: 1, 128>}, {transform_indices = @transform_12, window_bounds = array<i64: 1, 8, 128>}, {transform_indices = @transform_13, window_bounds = array<i64: 1, 2, 128>}, {transform_indices = @transform_14, window_bounds = array<i64: 1, 2, 128>}]} {
    %c0 = arith.constant 0 : index
    %c0_0 = arith.constant 0 : index
    %c0_1 = arith.constant 0 : index
    %0 = vector.load %arg1[%c0, %c0_0, %c0_1] : memref<1x8x128xf32, #tpu.memory_space<vmem>>, vector<1x8x128xf32>
    %c0_2 = arith.constant 0 : index
    %c0_3 = arith.constant 0 : index
    %c0_4 = arith.constant 0 : index
    %1 = vector.load %arg2[%c0_2, %c0_3, %c0_4] : memref<1x8x128xf32, #tpu.memory_space<vmem>>, vector<1x8x128xf32>
    %2 = tpu.iota {dimensions = array<i32: 0>} : vector<8x8xi32>
    %3 = tpu.iota {dimensions = array<i32: 1>} : vector<8x8xi32>
    %4 = arith.cmpi sle, %3, %2 : vector<8x8xi32>
    %5 = vector.shape_cast %4 : vector<8x8xi1> to vector<1x8x8xi1>
    %c0_5 = arith.constant 0 : index
    %c0_6 = arith.constant 0 : index
    %6 = vector.load %arg7[%c0_5, %c0_6] : memref<128x512xf32, #tpu.memory_space<vmem>>, vector<128x512xf32>
    "tpu.trace_start"() <{level = 10 : i32, message = "bsh,hk->bsk"}> : () -> ()
    %cst = arith.constant dense<0.000000e+00> : vector<1x8x512xf32>
    %7 = tpu.matmul %1, %6, %cst {dimension_numbers = #tpu.dot_dimension_numbers<[2], [0], [0, 1], [1], [0, 0, 0, 1, 1, 1], [], []>} : vector<1x8x128xf32>, vector<128x512xf32>, vector<1x8x512xf32> -> vector<1x8x512xf32>
    "tpu.trace_stop"() : () -> ()
    %c0_7 = arith.constant 0 : index
    %c0_8 = arith.constant 0 : index
    %8 = vector.load %arg8[%c0_7, %c0_8] : memref<1x512xf32, #tpu.memory_space<vmem>>, vector<1x512xf32>
    %9 = vector.shape_cast %8 : vector<1x512xf32> to vector<1x1x512xf32>
    %10 = vector.broadcast %9 : vector<1x1x512xf32> to vector<1x8x512xf32>
    %11 = arith.addf %7, %10 : vector<1x8x512xf32>
    %c0_9 = arith.constant 0 : index
    %c0_10 = arith.constant 0 : index
    %c0_11 = arith.constant 0 : index
    %12 = vector.load %arg3[%c0_9, %c0_10, %c0_11] : memref<2x128x384xf32, #tpu.memory_space<vmem>>, vector<1x128x384xf32>
    %13 = vector.shape_cast %12 : vector<1x128x384xf32> to vector<128x384xf32>
    "tpu.trace_start"() <{level = 10 : i32, message = "bth,hk->btk"}> : () -> ()
    %cst_12 = arith.constant dense<0.000000e+00> : vector<1x8x384xf32>
    %14 = tpu.matmul %0, %13, %cst_12 {dimension_numbers = #tpu.dot_dimension_numbers<[2], [0], [0, 1], [1], [0, 0, 0, 1, 1, 1], [], []>} : vector<1x8x128xf32>, vector<128x384xf32>, vector<1x8x384xf32> -> vector<1x8x384xf32>
    "tpu.trace_stop"() : () -> ()
    %c0_13 = arith.constant 0 : index
    %c0_14 = arith.constant 0 : index
    %c0_15 = arith.constant 0 : index
    %15 = vector.load %arg4[%c0_13, %c0_14, %c0_15] : memref<2x1x384xf32, #tpu.memory_space<vmem>>, vector<1x1x384xf32>
    %16 = vector.shape_cast %15 : vector<1x1x384xf32> to vector<1x384xf32>
    %17 = vector.shape_cast %16 : vector<1x384xf32> to vector<1x1x384xf32>
    %18 = vector.broadcast %17 : vector<1x1x384xf32> to vector<1x8x384xf32>
    %19 = arith.addf %14, %18 : vector<1x8x384xf32>
    %20 = vector.extract_strided_slice %19 {offsets = [0, 0, 0], sizes = [1, 8, 128], strides = [1, 1, 1]} : vector<1x8x384xf32> to vector<1x8x128xf32>
    %21 = vector.extract_strided_slice %19 {offsets = [0, 0, 128], sizes = [1, 8, 128], strides = [1, 1, 1]} : vector<1x8x384xf32> to vector<1x8x128xf32>
    %22 = vector.extract_strided_slice %19 {offsets = [0, 0, 256], sizes = [1, 8, 128], strides = [1, 1, 1]} : vector<1x8x384xf32> to vector<1x8x128xf32>
    "tpu.trace_start"() <{level = 10 : i32, message = "bqh,bkh->bqk"}> : () -> ()
    %cst_16 = arith.constant dense<0.000000e+00> : vector<1x8x8xf32>
    %23 = tpu.matmul %20, %21, %cst_16 {dimension_numbers = #tpu.dot_dimension_numbers<[2], [2], [1], [1], [0, 0, 0, 1, 1, 1], [0], [0]>} : vector<1x8x128xf32>, vector<1x8x128xf32>, vector<1x8x8xf32> -> vector<1x8x8xf32>
    "tpu.trace_stop"() : () -> ()
    %cst_17 = arith.constant 0.176776692 : f32
    %24 = vector.broadcast %cst_17 : f32 to vector<1x8x8xf32>
    %25 = arith.mulf %23, %24 : vector<1x8x8xf32>
    %cst_18 = arith.constant -1.000000e+07 : f32
    %26 = vector.broadcast %cst_18 : f32 to vector<1x8x8xf32>
    %27 = arith.select %5, %25, %26 : vector<1x8x8xi1>, vector<1x8x8xf32>
    %cst_19 = arith.constant dense<0xFF800000> : vector<1x8xf32>
    %28 = vector.multi_reduction <maximumf>, %27, %cst_19 [2] : vector<1x8x8xf32> to vector<1x8xf32>
    %29 = vector.shape_cast %28 : vector<1x8xf32> to vector<1x8x1xf32>
    %30 = vector.broadcast %29 : vector<1x8x1xf32> to vector<1x8x8xf32>
    %31 = arith.subf %27, %30 : vector<1x8x8xf32>
    %32 = math.exp %31 : vector<1x8x8xf32>
    %cst_20 = arith.constant dense<0.000000e+00> : vector<1x8xf32>
    %33 = vector.multi_reduction <add>, %32, %cst_20 [2] : vector<1x8x8xf32> to vector<1x8xf32>
    %34 = vector.shape_cast %33 : vector<1x8xf32> to vector<1x8x1xf32>
    %35 = tpu.reciprocal %34 {approx = true} : vector<1x8x1xf32> -> vector<1x8x1xf32>
    %36 = arith.mulf %34, %35 : vector<1x8x1xf32>
    %cst_21 = arith.constant 2.000000e+00 : f32
    %37 = vector.broadcast %cst_21 : f32 to vector<1x8x1xf32>
    %38 = arith.subf %37, %36 : vector<1x8x1xf32>
    %39 = arith.mulf %35, %38 : vector<1x8x1xf32>
    %40 = vector.broadcast %39 : vector<1x8x1xf32> to vector<1x8x8xf32>
    %41 = arith.mulf %32, %40 : vector<1x8x8xf32>
    %42 = vector.shape_cast %41 : vector<1x8x8xf32> to vector<1x64xf32>
    %cst_22 = arith.constant 0.000000e+00 : f32
    %43 = vector.broadcast %cst_22 : f32 to vector<1x64xf32>
    %44 = tpu.concatenate %42, %43 in 1 : vector<1x64xf32>, vector<1x64xf32> -> vector<1x128xf32>
    "tpu.trace_start"() <{level = 10 : i32, message = "bqk,bkh->bqh"}> : () -> ()
    %cst_23 = arith.constant dense<0.000000e+00> : vector<1x8x128xf32>
    %45 = tpu.matmul %41, %22, %cst_23 {dimension_numbers = #tpu.dot_dimension_numbers<[2], [1], [1], [2], [0, 0, 0, 1, 1, 2], [0], [0]>} : vector<1x8x8xf32>, vector<1x8x128xf32>, vector<1x8x128xf32> -> vector<1x8x128xf32>
    "tpu.trace_stop"() : () -> ()
    %46 = arith.addf %0, %45 : vector<1x8x128xf32>
    %c0_24 = arith.constant 0 : index
    %c0_25 = arith.constant 0 : index
    %c0_26 = arith.constant 0 : index
    %47 = vector.load %arg5[%c0_24, %c0_25, %c0_26] : memref<2x128x128xf32, #tpu.memory_space<vmem>>, vector<1x128x128xf32>
    %48 = vector.shape_cast %47 : vector<1x128x128xf32> to vector<128x128xf32>
    "tpu.trace_start"() <{level = 10 : i32, message = "bth,hk->btk"}> : () -> ()
    %cst_27 = arith.constant dense<0.000000e+00> : vector<1x8x128xf32>
    %49 = tpu.matmul %46, %48, %cst_27 {dimension_numbers = #tpu.dot_dimension_numbers<[2], [0], [0, 1], [1], [0, 0, 0, 1, 1, 1], [], []>} : vector<1x8x128xf32>, vector<128x128xf32>, vector<1x8x128xf32> -> vector<1x8x128xf32>
    "tpu.trace_stop"() : () -> ()
    %c0_28 = arith.constant 0 : index
    %c0_29 = arith.constant 0 : index
    %c0_30 = arith.constant 0 : index
    %50 = vector.load %arg6[%c0_28, %c0_29, %c0_30] : memref<2x1x128xf32, #tpu.memory_space<vmem>>, vector<1x1x128xf32>
    %51 = vector.shape_cast %50 : vector<1x1x128xf32> to vector<1x128xf32>
    %52 = vector.shape_cast %51 : vector<1x128xf32> to vector<1x1x128xf32>
    %53 = vector.broadcast %52 : vector<1x1x128xf32> to vector<1x8x128xf32>
    %54 = arith.addf %49, %53 : vector<1x8x128xf32>
    %55 = vector.extract_strided_slice %11 {offsets = [0, 0, 0], sizes = [1, 8, 128], strides = [1, 1, 1]} : vector<1x8x512xf32> to vector<1x8x128xf32>
    %56 = vector.extract_strided_slice %11 {offsets = [0, 0, 128], sizes = [1, 8, 128], strides = [1, 1, 1]} : vector<1x8x512xf32> to vector<1x8x128xf32>
    "tpu.trace_start"() <{level = 10 : i32, message = "bqh,bkh->bqk"}> : () -> ()
    %cst_31 = arith.constant dense<0.000000e+00> : vector<1x8x8xf32>
    %57 = tpu.matmul %54, %55, %cst_31 {dimension_numbers = #tpu.dot_dimension_numbers<[2], [2], [1], [1], [0, 0, 0, 1, 1, 1], [0], [0]>} : vector<1x8x128xf32>, vector<1x8x128xf32>, vector<1x8x8xf32> -> vector<1x8x8xf32>
    "tpu.trace_stop"() : () -> ()
    %cst_32 = arith.constant 0.176776692 : f32
    %58 = vector.broadcast %cst_32 : f32 to vector<1x8x8xf32>
    %59 = arith.mulf %57, %58 : vector<1x8x8xf32>
    %cst_33 = arith.constant dense<0xFF800000> : vector<1x8xf32>
    %60 = vector.multi_reduction <maximumf>, %59, %cst_33 [2] : vector<1x8x8xf32> to vector<1x8xf32>
    %61 = vector.shape_cast %60 : vector<1x8xf32> to vector<1x8x1xf32>
    %62 = vector.broadcast %61 : vector<1x8x1xf32> to vector<1x8x8xf32>
    %63 = arith.subf %59, %62 : vector<1x8x8xf32>
    %64 = math.exp %63 : vector<1x8x8xf32>
    %cst_34 = arith.constant dense<0.000000e+00> : vector<1x8xf32>
    %65 = vector.multi_reduction <add>, %64, %cst_34 [2] : vector<1x8x8xf32> to vector<1x8xf32>
    %66 = vector.shape_cast %65 : vector<1x8xf32> to vector<1x8x1xf32>
    %67 = tpu.reciprocal %66 {approx = true} : vector<1x8x1xf32> -> vector<1x8x1xf32>
    %68 = arith.mulf %66, %67 : vector<1x8x1xf32>
    %cst_35 = arith.constant 2.000000e+00 : f32
    %69 = vector.broadcast %cst_35 : f32 to vector<1x8x1xf32>
    %70 = arith.subf %69, %68 : vector<1x8x1xf32>
    %71 = arith.mulf %67, %70 : vector<1x8x1xf32>
    %72 = vector.broadcast %71 : vector<1x8x1xf32> to vector<1x8x8xf32>
    %73 = arith.mulf %64, %72 : vector<1x8x8xf32>
    %74 = vector.shape_cast %73 : vector<1x8x8xf32> to vector<1x64xf32>
    %cst_36 = arith.constant 0.000000e+00 : f32
    %75 = vector.broadcast %cst_36 : f32 to vector<1x64xf32>
    %76 = tpu.concatenate %74, %75 in 1 : vector<1x64xf32>, vector<1x64xf32> -> vector<1x128xf32>
    "tpu.trace_start"() <{level = 10 : i32, message = "bqk,bkh->bqh"}> : () -> ()
    %cst_37 = arith.constant dense<0.000000e+00> : vector<1x8x128xf32>
    %77 = tpu.matmul %73, %56, %cst_37 {dimension_numbers = #tpu.dot_dimension_numbers<[2], [1], [1], [2], [0, 0, 0, 1, 1, 2], [0], [0]>} : vector<1x8x8xf32>, vector<1x8x128xf32>, vector<1x8x128xf32> -> vector<1x8x128xf32>
    "tpu.trace_stop"() : () -> ()
    %78 = arith.addf %46, %77 : vector<1x8x128xf32>
    %c0_38 = arith.constant 0 : index
    %c0_39 = arith.constant 0 : index
    %c0_40 = arith.constant 0 : index
    %79 = vector.load %arg9[%c0_38, %c0_39, %c0_40] : memref<2x128x128xf32, #tpu.memory_space<vmem>>, vector<1x128x128xf32>
    %80 = vector.shape_cast %79 : vector<1x128x128xf32> to vector<128x128xf32>
    "tpu.trace_start"() <{level = 10 : i32, message = "bth,hk->btk"}> : () -> ()
    %cst_41 = arith.constant dense<0.000000e+00> : vector<1x8x128xf32>
    %81 = tpu.matmul %78, %80, %cst_41 {dimension_numbers = #tpu.dot_dimension_numbers<[2], [0], [0, 1], [1], [0, 0, 0, 1, 1, 1], [], []>} : vector<1x8x128xf32>, vector<128x128xf32>, vector<1x8x128xf32> -> vector<1x8x128xf32>
    "tpu.trace_stop"() : () -> ()
    %c0_42 = arith.constant 0 : index
    %c0_43 = arith.constant 0 : index
    %c0_44 = arith.constant 0 : index
    %82 = vector.load %arg10[%c0_42, %c0_43, %c0_44] : memref<2x1x128xf32, #tpu.memory_space<vmem>>, vector<1x1x128xf32>
    %83 = vector.shape_cast %82 : vector<1x1x128xf32> to vector<1x128xf32>
    %84 = vector.shape_cast %83 : vector<1x128xf32> to vector<1x1x128xf32>
    %85 = vector.broadcast %84 : vector<1x1x128xf32> to vector<1x8x128xf32>
    %86 = arith.addf %81, %85 : vector<1x8x128xf32>
    %cst_45 = arith.constant 0.000000e+00 : f32
    %87 = vector.broadcast %cst_45 : f32 to vector<1x8x128xf32>
    %88 = arith.maximumf %86, %87 : vector<1x8x128xf32>
    %89 = arith.addf %78, %88 : vector<1x8x128xf32>
    %c1 = arith.constant 1 : index
    %c0_46 = arith.constant 0 : index
    %c0_47 = arith.constant 0 : index
    %90 = vector.load %arg3[%c1, %c0_46, %c0_47] : memref<2x128x384xf32, #tpu.memory_space<vmem>>, vector<1x128x384xf32>
    %91 = vector.shape_cast %90 : vector<1x128x384xf32> to vector<128x384xf32>
    "tpu.trace_start"() <{level = 10 : i32, message = "bth,hk->btk"}> : () -> ()
    %cst_48 = arith.constant dense<0.000000e+00> : vector<1x8x384xf32>
    %92 = tpu.matmul %89, %91, %cst_48 {dimension_numbers = #tpu.dot_dimension_numbers<[2], [0], [0, 1], [1], [0, 0, 0, 1, 1, 1], [], []>} : vector<1x8x128xf32>, vector<128x384xf32>, vector<1x8x384xf32> -> vector<1x8x384xf32>
    "tpu.trace_stop"() : () -> ()
    %c1_49 = arith.constant 1 : index
    %c0_50 = arith.constant 0 : index
    %c0_51 = arith.constant 0 : index
    %93 = vector.load %arg4[%c1_49, %c0_50, %c0_51] : memref<2x1x384xf32, #tpu.memory_space<vmem>>, vector<1x1x384xf32>
    %94 = vector.shape_cast %93 : vector<1x1x384xf32> to vector<1x384xf32>
    %95 = vector.shape_cast %94 : vector<1x384xf32> to vector<1x1x384xf32>
    %96 = vector.broadcast %95 : vector<1x1x384xf32> to vector<1x8x384xf32>
    %97 = arith.addf %92, %96 : vector<1x8x384xf32>
    %98 = vector.extract_strided_slice %97 {offsets = [0, 0, 0], sizes = [1, 8, 128], strides = [1, 1, 1]} : vector<1x8x384xf32> to vector<1x8x128xf32>
    %99 = vector.extract_strided_slice %97 {offsets = [0, 0, 128], sizes = [1, 8, 128], strides = [1, 1, 1]} : vector<1x8x384xf32> to vector<1x8x128xf32>
    %100 = vector.extract_strided_slice %97 {offsets = [0, 0, 256], sizes = [1, 8, 128], strides = [1, 1, 1]} : vector<1x8x384xf32> to vector<1x8x128xf32>
    "tpu.trace_start"() <{level = 10 : i32, message = "bqh,bkh->bqk"}> : () -> ()
    %cst_52 = arith.constant dense<0.000000e+00> : vector<1x8x8xf32>
    %101 = tpu.matmul %98, %99, %cst_52 {dimension_numbers = #tpu.dot_dimension_numbers<[2], [2], [1], [1], [0, 0, 0, 1, 1, 1], [0], [0]>} : vector<1x8x128xf32>, vector<1x8x128xf32>, vector<1x8x8xf32> -> vector<1x8x8xf32>
    "tpu.trace_stop"() : () -> ()
    %cst_53 = arith.constant 0.176776692 : f32
    %102 = vector.broadcast %cst_53 : f32 to vector<1x8x8xf32>
    %103 = arith.mulf %101, %102 : vector<1x8x8xf32>
    %cst_54 = arith.constant -1.000000e+07 : f32
    %104 = vector.broadcast %cst_54 : f32 to vector<1x8x8xf32>
    %105 = arith.select %5, %103, %104 : vector<1x8x8xi1>, vector<1x8x8xf32>
    %cst_55 = arith.constant dense<0xFF800000> : vector<1x8xf32>
    %106 = vector.multi_reduction <maximumf>, %105, %cst_55 [2] : vector<1x8x8xf32> to vector<1x8xf32>
    %107 = vector.shape_cast %106 : vector<1x8xf32> to vector<1x8x1xf32>
    %108 = vector.broadcast %107 : vector<1x8x1xf32> to vector<1x8x8xf32>
    %109 = arith.subf %105, %108 : vector<1x8x8xf32>
    %110 = math.exp %109 : vector<1x8x8xf32>
    %cst_56 = arith.constant dense<0.000000e+00> : vector<1x8xf32>
    %111 = vector.multi_reduction <add>, %110, %cst_56 [2] : vector<1x8x8xf32> to vector<1x8xf32>
    %112 = vector.shape_cast %111 : vector<1x8xf32> to vector<1x8x1xf32>
    %113 = tpu.reciprocal %112 {approx = true} : vector<1x8x1xf32> -> vector<1x8x1xf32>
    %114 = arith.mulf %112, %113 : vector<1x8x1xf32>
    %cst_57 = arith.constant 2.000000e+00 : f32
    %115 = vector.broadcast %cst_57 : f32 to vector<1x8x1xf32>
    %116 = arith.subf %115, %114 : vector<1x8x1xf32>
    %117 = arith.mulf %113, %116 : vector<1x8x1xf32>
    %118 = vector.broadcast %117 : vector<1x8x1xf32> to vector<1x8x8xf32>
    %119 = arith.mulf %110, %118 : vector<1x8x8xf32>
    %120 = vector.shape_cast %119 : vector<1x8x8xf32> to vector<1x64xf32>
    %cst_58 = arith.constant 0.000000e+00 : f32
    %121 = vector.broadcast %cst_58 : f32 to vector<1x64xf32>
    %122 = tpu.concatenate %120, %121 in 1 : vector<1x64xf32>, vector<1x64xf32> -> vector<1x128xf32>
    "tpu.trace_start"() <{level = 10 : i32, message = "bqk,bkh->bqh"}> : () -> ()
    %cst_59 = arith.constant dense<0.000000e+00> : vector<1x8x128xf32>
    %123 = tpu.matmul %119, %100, %cst_59 {dimension_numbers = #tpu.dot_dimension_numbers<[2], [1], [1], [2], [0, 0, 0, 1, 1, 2], [0], [0]>} : vector<1x8x8xf32>, vector<1x8x128xf32>, vector<1x8x128xf32> -> vector<1x8x128xf32>
    "tpu.trace_stop"() : () -> ()
    %124 = arith.addf %89, %123 : vector<1x8x128xf32>
    %c1_60 = arith.constant 1 : index
    %c0_61 = arith.constant 0 : index
    %c0_62 = arith.constant 0 : index
    %125 = vector.load %arg5[%c1_60, %c0_61, %c0_62] : memref<2x128x128xf32, #tpu.memory_space<vmem>>, vector<1x128x128xf32>
    %126 = vector.shape_cast %125 : vector<1x128x128xf32> to vector<128x128xf32>
    "tpu.trace_start"() <{level = 10 : i32, message = "bth,hk->btk"}> : () -> ()
    %cst_63 = arith.constant dense<0.000000e+00> : vector<1x8x128xf32>
    %127 = tpu.matmul %124, %126, %cst_63 {dimension_numbers = #tpu.dot_dimension_numbers<[2], [0], [0, 1], [1], [0, 0, 0, 1, 1, 1], [], []>} : vector<1x8x128xf32>, vector<128x128xf32>, vector<1x8x128xf32> -> vector<1x8x128xf32>
    "tpu.trace_stop"() : () -> ()
    %c1_64 = arith.constant 1 : index
    %c0_65 = arith.constant 0 : index
    %c0_66 = arith.constant 0 : index
    %128 = vector.load %arg6[%c1_64, %c0_65, %c0_66] : memref<2x1x128xf32, #tpu.memory_space<vmem>>, vector<1x1x128xf32>
    %129 = vector.shape_cast %128 : vector<1x1x128xf32> to vector<1x128xf32>
    %130 = vector.shape_cast %129 : vector<1x128xf32> to vector<1x1x128xf32>
    %131 = vector.broadcast %130 : vector<1x1x128xf32> to vector<1x8x128xf32>
    %132 = arith.addf %127, %131 : vector<1x8x128xf32>
    %133 = vector.extract_strided_slice %11 {offsets = [0, 0, 256], sizes = [1, 8, 128], strides = [1, 1, 1]} : vector<1x8x512xf32> to vector<1x8x128xf32>
    %134 = vector.extract_strided_slice %11 {offsets = [0, 0, 384], sizes = [1, 8, 128], strides = [1, 1, 1]} : vector<1x8x512xf32> to vector<1x8x128xf32>
    "tpu.trace_start"() <{level = 10 : i32, message = "bqh,bkh->bqk"}> : () -> ()
    %cst_67 = arith.constant dense<0.000000e+00> : vector<1x8x8xf32>
    %135 = tpu.matmul %132, %133, %cst_67 {dimension_numbers = #tpu.dot_dimension_numbers<[2], [2], [1], [1], [0, 0, 0, 1, 1, 1], [0], [0]>} : vector<1x8x128xf32>, vector<1x8x128xf32>, vector<1x8x8xf32> -> vector<1x8x8xf32>
    "tpu.trace_stop"() : () -> ()
    %cst_68 = arith.constant 0.176776692 : f32
    %136 = vector.broadcast %cst_68 : f32 to vector<1x8x8xf32>
    %137 = arith.mulf %135, %136 : vector<1x8x8xf32>
    %cst_69 = arith.constant dense<0xFF800000> : vector<1x8xf32>
    %138 = vector.multi_reduction <maximumf>, %137, %cst_69 [2] : vector<1x8x8xf32> to vector<1x8xf32>
    %139 = vector.shape_cast %138 : vector<1x8xf32> to vector<1x8x1xf32>
    %140 = vector.broadcast %139 : vector<1x8x1xf32> to vector<1x8x8xf32>
    %141 = arith.subf %137, %140 : vector<1x8x8xf32>
    %142 = math.exp %141 : vector<1x8x8xf32>
    %cst_70 = arith.constant dense<0.000000e+00> : vector<1x8xf32>
    %143 = vector.multi_reduction <add>, %142, %cst_70 [2] : vector<1x8x8xf32> to vector<1x8xf32>
    %144 = vector.shape_cast %143 : vector<1x8xf32> to vector<1x8x1xf32>
    %145 = tpu.reciprocal %144 {approx = true} : vector<1x8x1xf32> -> vector<1x8x1xf32>
    %146 = arith.mulf %144, %145 : vector<1x8x1xf32>
    %cst_71 = arith.constant 2.000000e+00 : f32
    %147 = vector.broadcast %cst_71 : f32 to vector<1x8x1xf32>
    %148 = arith.subf %147, %146 : vector<1x8x1xf32>
    %149 = arith.mulf %145, %148 : vector<1x8x1xf32>
    %150 = vector.broadcast %149 : vector<1x8x1xf32> to vector<1x8x8xf32>
    %151 = arith.mulf %142, %150 : vector<1x8x8xf32>
    %152 = vector.shape_cast %151 : vector<1x8x8xf32> to vector<1x64xf32>
    %cst_72 = arith.constant 0.000000e+00 : f32
    %153 = vector.broadcast %cst_72 : f32 to vector<1x64xf32>
    %154 = tpu.concatenate %152, %153 in 1 : vector<1x64xf32>, vector<1x64xf32> -> vector<1x128xf32>
    "tpu.trace_start"() <{level = 10 : i32, message = "bqk,bkh->bqh"}> : () -> ()
    %cst_73 = arith.constant dense<0.000000e+00> : vector<1x8x128xf32>
    %155 = tpu.matmul %151, %134, %cst_73 {dimension_numbers = #tpu.dot_dimension_numbers<[2], [1], [1], [2], [0, 0, 0, 1, 1, 2], [0], [0]>} : vector<1x8x8xf32>, vector<1x8x128xf32>, vector<1x8x128xf32> -> vector<1x8x128xf32>
    "tpu.trace_stop"() : () -> ()
    %156 = arith.addf %124, %155 : vector<1x8x128xf32>
    %c1_74 = arith.constant 1 : index
    %c0_75 = arith.constant 0 : index
    %c0_76 = arith.constant 0 : index
    %157 = vector.load %arg9[%c1_74, %c0_75, %c0_76] : memref<2x128x128xf32, #tpu.memory_space<vmem>>, vector<1x128x128xf32>
    %158 = vector.shape_cast %157 : vector<1x128x128xf32> to vector<128x128xf32>
    "tpu.trace_start"() <{level = 10 : i32, message = "bth,hk->btk"}> : () -> ()
    %cst_77 = arith.constant dense<0.000000e+00> : vector<1x8x128xf32>
    %159 = tpu.matmul %156, %158, %cst_77 {dimension_numbers = #tpu.dot_dimension_numbers<[2], [0], [0, 1], [1], [0, 0, 0, 1, 1, 1], [], []>} : vector<1x8x128xf32>, vector<128x128xf32>, vector<1x8x128xf32> -> vector<1x8x128xf32>
    "tpu.trace_stop"() : () -> ()
    %c1_78 = arith.constant 1 : index
    %c0_79 = arith.constant 0 : index
    %c0_80 = arith.constant 0 : index
    %160 = vector.load %arg10[%c1_78, %c0_79, %c0_80] : memref<2x1x128xf32, #tpu.memory_space<vmem>>, vector<1x1x128xf32>
    %161 = vector.shape_cast %160 : vector<1x1x128xf32> to vector<1x128xf32>
    %162 = vector.shape_cast %161 : vector<1x128xf32> to vector<1x1x128xf32>
    %163 = vector.broadcast %162 : vector<1x1x128xf32> to vector<1x8x128xf32>
    %164 = arith.addf %159, %163 : vector<1x8x128xf32>
    %cst_81 = arith.constant 0.000000e+00 : f32
    %165 = vector.broadcast %cst_81 : f32 to vector<1x8x128xf32>
    %166 = arith.maximumf %164, %165 : vector<1x8x128xf32>
    %167 = arith.addf %156, %166 : vector<1x8x128xf32>
    %c0_82 = arith.constant 0 : index
    %c0_83 = arith.constant 0 : index
    %168 = vector.load %arg11[%c0_82, %c0_83] : memref<128x128xf32, #tpu.memory_space<vmem>>, vector<128x128xf32>
    "tpu.trace_start"() <{level = 10 : i32, message = "bth,hv->btv"}> : () -> ()
    %cst_84 = arith.constant dense<0.000000e+00> : vector<1x8x128xf32>
    %169 = tpu.matmul %167, %168, %cst_84 {dimension_numbers = #tpu.dot_dimension_numbers<[2], [0], [0, 1], [1], [0, 0, 0, 1, 1, 1], [], []>} : vector<1x8x128xf32>, vector<128x128xf32>, vector<1x8x128xf32> -> vector<1x8x128xf32>
    "tpu.trace_stop"() : () -> ()
    %c0_85 = arith.constant 0 : index
    %c0_86 = arith.constant 0 : index
    %170 = vector.load %arg12[%c0_85, %c0_86] : memref<1x128xf32, #tpu.memory_space<vmem>>, vector<1x128xf32>
    %171 = vector.shape_cast %170 : vector<1x128xf32> to vector<1x1x128xf32>
    %172 = vector.broadcast %171 : vector<1x1x128xf32> to vector<1x8x128xf32>
    %173 = arith.addf %169, %172 : vector<1x8x128xf32>
    %c0_87 = arith.constant 0 : index
    %c0_88 = arith.constant 0 : index
    %c0_89 = arith.constant 0 : index
    %174 = vector.load %arg13[%c0_87, %c0_88, %c0_89] : memref<1x8x128xf32, #tpu.memory_space<vmem>>, vector<1x8x128xf32>
    tpu.vector_store %arg13[%c0_87, %c0_88, %c0_89], %173 {strides = array<i32>} : memref<1x8x128xf32, #tpu.memory_space<vmem>>, vector<1x8x128xf32>,
    %175 = vector.shape_cast %76 : vector<1x128xf32> to vector<1x1x128xf32>
    %176 = vector.shape_cast %154 : vector<1x128xf32> to vector<1x1x128xf32>
    %177 = tpu.concatenate %175, %176 in 1 : vector<1x1x128xf32>, vector<1x1x128xf32> -> vector<1x2x128xf32>
    %c0_90 = arith.constant 0 : index
    %c0_91 = arith.constant 0 : index
    %c0_92 = arith.constant 0 : index
    %178 = vector.load %arg14[%c0_90, %c0_91, %c0_92] : memref<1x2x128xf32, #tpu.memory_space<vmem>>, vector<1x2x128xf32>
    tpu.vector_store %arg14[%c0_90, %c0_91, %c0_92], %177 {strides = array<i32>} : memref<1x2x128xf32, #tpu.memory_space<vmem>>, vector<1x2x128xf32>,
    %179 = vector.shape_cast %44 : vector<1x128xf32> to vector<1x1x128xf32>
    %180 = vector.shape_cast %122 : vector<1x128xf32> to vector<1x1x128xf32>
    %181 = tpu.concatenate %179, %180 in 1 : vector<1x1x128xf32>, vector<1x1x128xf32> -> vector<1x2x128xf32>
    %c0_93 = arith.constant 0 : index
    %c0_94 = arith.constant 0 : index
    %c0_95 = arith.constant 0 : index
    %182 = vector.load %arg15[%c0_93, %c0_94, %c0_95] : memref<1x2x128xf32, #tpu.memory_space<vmem>>, vector<1x2x128xf32>
    tpu.vector_store %arg15[%c0_93, %c0_94, %c0_95], %181 {strides = array<i32>} : memref<1x2x128xf32, #tpu.memory_space<vmem>>, vector<1x2x128xf32>,
    return
  }
  func.func @transform_0(%arg0: i32) -> (i32, i32, i32) {
    %c0_i32 = arith.constant 0 : i32
    %c0_i32_0 = arith.constant 0 : i32
    %c0_i32_1 = arith.constant 0 : i32
    return %arg0, %c0_i32, %c0_i32_0 : i32, i32, i32
  }
  func.func @transform_1(%arg0: i32) -> (i32, i32, i32) {
    %c0_i32 = arith.constant 0 : i32
    %c0_i32_0 = arith.constant 0 : i32
    %c0_i32_1 = arith.constant 0 : i32
    return %arg0, %c0_i32, %c0_i32_0 : i32, i32, i32
  }
  func.func @transform_2(%arg0: i32) -> (i32, i32, i32) {
    %c0_i32 = arith.constant 0 : i32
    %c0_i32_0 = arith.constant 0 : i32
    %c0_i32_1 = arith.constant 0 : i32
    %c0_i32_2 = arith.constant 0 : i32
    return %c0_i32, %c0_i32_0, %c0_i32_1 : i32, i32, i32
  }
  func.func @transform_3(%arg0: i32) -> (i32, i32, i32) {
    %c0_i32 = arith.constant 0 : i32
    %c0_i32_0 = arith.constant 0 : i32
    %c0_i32_1 = arith.constant 0 : i32
    %c0_i32_2 = arith.constant 0 : i32
    return %c0_i32, %c0_i32_0, %c0_i32_1 : i32, i32, i32
  }
  func.func @transform_4(%arg0: i32) -> (i32, i32, i32) {
    %c0_i32 = arith.constant 0 : i32
    %c0_i32_0 = arith.constant 0 : i32
    %c0_i32_1 = arith.constant 0 : i32
    %c0_i32_2 = arith.constant 0 : i32
    return %c0_i32, %c0_i32_0, %c0_i32_1 : i32, i32, i32
  }
  func.func @transform_5(%arg0: i32) -> (i32, i32, i32) {
    %c0_i32 = arith.constant 0 : i32
    %c0_i32_0 = arith.constant 0 : i32
    %c0_i32_1 = arith.constant 0 : i32
    %c0_i32_2 = arith.constant 0 : i32
    return %c0_i32, %c0_i32_0, %c0_i32_1 : i32, i32, i32
  }
  func.func @transform_6(%arg0: i32) -> (i32, i32) {
    %c0_i32 = arith.constant 0 : i32
    %c0_i32_0 = arith.constant 0 : i32
    %c0_i32_1 = arith.constant 0 : i32
    return %c0_i32, %c0_i32_0 : i32, i32
  }
  func.func @transform_7(%arg0: i32) -> (i32, i32) {
    %c0_i32 = arith.constant 0 : i32
    %c0_i32_0 = arith.constant 0 : i32
    %c0_i32_1 = arith.constant 0 : i32
    return %c0_i32, %c0_i32_0 : i32, i32
  }
  func.func @transform_8(%arg0: i32) -> (i32, i32, i32) {
    %c0_i32 = arith.constant 0 : i32
    %c0_i32_0 = arith.constant 0 : i32
    %c0_i32_1 = arith.constant 0 : i32
    %c0_i32_2 = arith.constant 0 : i32
    return %c0_i32, %c0_i32_0, %c0_i32_1 : i32, i32, i32
  }
  func.func @transform_9(%arg0: i32) -> (i32, i32, i32) {
    %c0_i32 = arith.constant 0 : i32
    %c0_i32_0 = arith.constant 0 : i32
    %c0_i32_1 = arith.constant 0 : i32
    %c0_i32_2 = arith.constant 0 : i32
    return %c0_i32, %c0_i32_0, %c0_i32_1 : i32, i32, i32
  }
  func.func @transform_10(%arg0: i32) -> (i32, i32) {
    %c0_i32 = arith.constant 0 : i32
    %c0_i32_0 = arith.constant 0 : i32
    %c0_i32_1 = arith.constant 0 : i32
    return %c0_i32, %c0_i32_0 : i32, i32
  }
  func.func @transform_11(%arg0: i32) -> (i32, i32) {
    %c0_i32 = arith.constant 0 : i32
    %c0_i32_0 = arith.constant 0 : i32
    %c0_i32_1 = arith.constant 0 : i32
    return %c0_i32, %c0_i32_0 : i32, i32
  }
  func.func @transform_12(%arg0: i32) -> (i32, i32, i32) {
    %c0_i32 = arith.constant 0 : i32
    %c0_i32_0 = arith.constant 0 : i32
    %c0_i32_1 = arith.constant 0 : i32
    return %arg0, %c0_i32, %c0_i32_0 : i32, i32, i32
  }
  func.func @transform_13(%arg0: i32) -> (i32, i32, i32) {
    %c0_i32 = arith.constant 0 : i32
    %c0_i32_0 = arith.constant 0 : i32
    %c0_i32_1 = arith.constant 0 : i32
    return %arg0, %c0_i32, %c0_i32_0 : i32, i32, i32
  }
  func.func @transform_14(%arg0: i32) -> (i32, i32, i32) {
    %c0_i32 = arith.constant 0 : i32
    %c0_i32_0 = arith.constant 0 : i32
    %c0_i32_1 = arith.constant 0 : i32
    return %arg0, %c0_i32, %c0_i32_0 : i32, i32, i32
  }
}

</mosaic_0001>

<bundles_post_ra>
// kernel: tpu_custom_call.1
= control target key start
LH: loop header
LB: loop body
LE: loop exit
PB: predicated region body
PF: predicated region fallthrough
CT: control target
= control target key end

     0   :  { %s3311_s0 = inlined_call_operand.hbm [shape: f32[2,8,128], index: 0, kind: input, shape index: {}]   ;;  %s3312_s1 = inlined_call_operand.hbm [shape: f32[2,8,128], index: 1, kind: input, shape index: {}]   ;;  %s3313_s2 = inlined_call_operand.hbm [shape: f32[2,128,384], index: 2, kind: input, shape index: {}]   ;;  %s3314_s3 = inlined_call_operand.hbm [shape: f32[2,1,384], index: 3, kind: input, shape index: {}]   ;;  %s3315_s4 = inlined_call_operand.hbm [shape: f32[2,128,128], index: 4, kind: input, shape index: {}]   ;;  %s3316_s5 = inlined_call_operand.vmem [shape: f32[2,1,128], index: 5, kind: input, shape index: {}]   ;;  %s3317_s6 = inlined_call_operand.hbm [shape: f32[128,512], index: 6, kind: input, shape index: {}]   ;;  %s3318_s7 = inlined_call_operand.vmem [shape: f32[1,512], index: 7, kind: input, shape index: {}]   ;;  %s3319_s8 = inlined_call_operand.hbm [shape: f32[2,128,128], index: 8, kind: input, shape index: {}]   ;;  %s3320_s9 = inlined_call_operand.vmem [shape: f32[2,1,128], index: 9, kind: input, shape index: {}]   ;;  %s3321_s10 = inlined_call_operand.hbm [shape: f32[128,128], index: 10, kind: input, shape index: {}]   ;;  %s3322_s11 = inlined_call_operand.vmem [shape: f32[1,128], index: 11, kind: input, shape index: {}]   ;;  %s3323_s12 = inlined_call_operand.hbm [shape: f32[2,8,128], index: 12, kind: output, shape index: {0}]   ;;  %s3324_s13 = inlined_call_operand.hbm [shape: f32[2,2,128], index: 13, kind: output, shape index: {1}]   ;;  %s3325_s14 = inlined_call_operand.hbm [shape: f32[2,2,128], index: 14, kind: output, shape index: {2}]  }
   0x1   :  { %3332 = sst [smem:[#allocation29_spill]] %s3311_s0 }
   0x2   :  { %3333 = sst [smem:[#allocation30_spill]] %s3312_s1 }
   0x3   :  { %3334 = sst [smem:[#allocation31_spill]] %s3313_s2 }
   0x4   :  { %3335 = sst [smem:[#allocation32_spill]] %s3314_s3 }
   0x5   :  { %3336 = sst [smem:[#allocation33_spill]] %s3315_s4 }
   0x6   :  { %3337 = sst [smem:[#allocation34_spill]] %s3316_s5 }
   0x7   :  { %3338 = sst [smem:[#allocation35_spill]] %s3317_s6 }
   0x8   :  { %3339 = sst [smem:[#allocation36_spill]] %s3319_s8 }
   0x9   :  { %3340 = sst [smem:[#allocation37_spill]] %s3320_s9 }
   0xa   :  { %3341 = sst [smem:[#allocation38_spill]] %s3321_s10 }
   0xb   :  { %3342 = sst [smem:[#allocation39_spill]] %s3322_s11 }
   0xc   :  { %3343 = sst [smem:[#allocation40_spill]] %s3323_s12 }
   0xd   :  { %3344 = sst [smem:[#allocation41_spill]] %s3324_s13 }
   0xe   :  { %3345 = sst [smem:[#allocation42_spill]] %s3325_s14 }
   0xf   :  { %20 = vsyncpa [#allocation3], 0 }
  0x10   :  { %22 = vsyncpa [#allocation3 + $0x1], 0 }
  0x11   :  { %23 = vsyncpa [#allocation6], 0 }
  0x12   :  { %25 = vsyncpa [#allocation6 + $0x1], 0 }
  0x13   :  { %26 = vsyncpa [#allocation9], 0 }
  0x14   :  { %27 = vsyncpa [#allocation12], 0 }
  0x15   :  { %28 = vsyncpa [#allocation15], 0 }
  0x16   :  { %29 = vsyncpa [#allocation4], 0 }
  0x17   :  { %31 = vsyncpa [#allocation4 + $0x1], 0 }
  0x18   :  { %32 = vsyncpa [#allocation18], 0 }
  0x19   :  { %34 = vsyncpa [#allocation18 + $0x1], 0  ;;  %s2751_s29 = smov 0   ;;  %s2753_s30 = smov 0  }
  0x1a   :  { %s2755_s15 = smov 0   ;;  %s2757_s16 = smov 0  }
  0x1b LB: > { %s3346_s2 = sld [smem:[#allocation31_spill]]  ;;  %s2775_s20 = sadd.s32 4294967295, %s2651_s16   ;;  %s2651_s16 = sphi %s2757_s16, %s3374_s16   ;;  %s2647_s15 = sphi %s2755_s15, %s3373_s15   ;;  %s2643_s30 = sphi %s2753_s30, %s3372_s30   ;;  %s2639_s29 = sphi %s2751_s29, %s3371_s29  }
  0x1c   : > { %p2067_p0 = scmp.ge.s32.totalorder %s2651_s16, 1  ;;  %p61_p1 = scmp.eq.s32.totalorder %s2775_s20, 0 }
  0x1d   : > { %p385_p2 = scmp.lt.s32.totalorder %s2651_s16, 3  ;;  %s2653_s22 = smov [#allocation7]  }
  0x1e   : > { %s398_s23 = sshll.u32 %s2653_s22, 4  ;;  %s3348_s3 = sld [smem:[#allocation32_spill]]  ;;  %s399_s23 = int_to_ptr.vmem [resolvable:$true] %s398_s23 }
  0x1f   : > { %p2780_p3 = pnand %p2067_p0, %p385_p2  ;;  %s2654_s28 = smov [#allocation8]  }
  0x20   : > { %s412_s17 = sshll.u32 %s2654_s28, 4  ;;  %s2655_s18 = smov 384   ;;  %s413_s17 = int_to_ptr.vmem [resolvable:$true] %s412_s17 }
  0x21   : > { %s396_s19 = sshll.u32 %s3346_s2, 4  ;;  %p2139_p4 = pneg %p2780_p3  ;;  %s397_s19 = int_to_ptr.hbm [resolvable:$true] %s396_s19 }
  0x22   : > { %s2656_s22 = smov 24   ;;  %s2657_s2 = smov 48  }
  0x23   : > { %p2792_p6 = pnand %p2139_p4, %p61_p1  ;;  %s2658_s11 = smov 3  }
  0x24   : > { %s410_s26 = sshll.u32 %s3348_s3, 4  ;;  %s3350_s6 = sld [smem:[#allocation35_spill]]  ;;  %s411_s26 = int_to_ptr.hbm [resolvable:$true] %s410_s26 }
  0x25   : > { %2142 = dma.hbm_to_vmem [thread:$0]  (!%p2792_p6), %s397_s19, 12288, %s399_s23, [#allocation6], %s2655_s18, %s2655_s18, %s2656_s22  }
  0x26   : > { %2145 = dma.hbm_to_vmem [thread:$0]  (!%p2792_p6), %s411_s26, 96, %s413_s17, [#allocation9], %s2657_s2, %s2657_s2, %s2658_s11  }
  0x27   : > { %s2659_s12 = smov [#allocation11]   ;;  %s3351_s4 = sld [smem:[#allocation33_spill]] }
  0x28   : > { %s443_s14 = sshll.u32 %s2659_s12, 4  ;;  %s2660_s5 = smov 512   ;;  %s444_s14 = int_to_ptr.vmem [resolvable:$true] %s443_s14 }
  0x29   : > { %s2661_s19 = smov 32   ;;  %s2662_s2 = smov [#allocation10]  }
  0x2a   : > { %s441_s3 = sshll.u32 %s3350_s6, 4  ;;  %s426_s11 = sshll.u32 %s2662_s2, 4  ;;  %s442_s3 = int_to_ptr.hbm [resolvable:$true] %s441_s3  ;;  %s427_s11 = int_to_ptr.vmem [resolvable:$true] %s426_s11 }
  0x2b   : > { %2151 = dma.hbm_to_vmem [thread:$0]  (!%p2792_p6), %s442_s3, 8192, %s444_s14, [#allocation12], %s2660_s5, %s2660_s5, %s2661_s19  }
  0x2c   : > { %s2663_s23 = smov 128   ;;  %s2664_s26 = smov 8  }
  0x2d   : > { %s424_s9 = sshll.u32 %s3351_s4, 4  ;;  %s3352_s8 = sld [smem:[#allocation36_spill]]  ;;  %s425_s9 = int_to_ptr.hbm [resolvable:$true] %s424_s9 }
  0x2e   : > { %2148 = dma.hbm_to_vmem [thread:$0]  (!%p2792_p6), %s425_s9, 4096, %s427_s11, [#allocation9], %s2663_s23, %s2663_s23, %s2664_s26  }
  0x2f   : > { %s2665_s3 = smov [#allocation13]   ;;  %s3353_s10 = sld [smem:[#allocation38_spill]] }
  0x30   : > { %s460_s5 = sshll.u32 %s2665_s3, 4  ;;  %s2666_s9 = smov [#allocation14]   ;;  %s461_s5 = int_to_ptr.vmem [resolvable:$true] %s460_s5 }
  0x31   : > { %s477_s24 = sshll.u32 %s2666_s9, 4  ;;  %s3331_s25 = sadd.s32 4294967294, %s2651_s16   ;;  %s478_s24 = int_to_ptr.vmem [resolvable:$true] %s477_s24 }
  0x32   : > { %s2822_s28 = sadd.s32 1, %s2651_s16   ;;  %s47_s2 = sadd.s32 1, %s2647_s15 }
  0x33   : > { %s458_s17 = sshll.u32 %s3352_s8, 4  ;;  %s44_s19 = ssub.s32 %s2651_s16, %s2822_s28  ;;  %s459_s17 = int_to_ptr.hbm [resolvable:$true] %s458_s17 }
  0x34   : > { %2154 = dma.hbm_to_vmem [thread:$0]  (!%p2792_p6), %s459_s17, 4096, %s461_s5, [#allocation12], %s2663_s23, %s2663_s23, %s2664_s26  }
  0x35   : > { %s475_s22 = sshll.u32 %s3353_s10, 4  ;;  %p45_p7 = scmp.eq.s32.totalorder %s44_s19, 0  ;;  %s476_s22 = int_to_ptr.hbm [resolvable:$true] %s475_s22 }
  0x36   : > { %2157 = dma.hbm_to_vmem [thread:$0]  (!%p2792_p6), %s476_s22, 2048, %s478_s24, [#allocation15], %s2663_s23, %s2663_s23, %s2664_s26  }
  0x37   : > { %p54_p8 = scmp.ne.s32.totalorder %s2647_s15, %s2643_s30  ;;  %p55_p9 = scmp.eq.s32.totalorder %s2651_s16, 0 }
  0x38   : > { %p60_p10 = scmp.ne.s32.totalorder %s2643_s30, %s2639_s29  ;;  %p320_p13 = scmp.eq.s32.totalorder %s2775_s20, 1 }
  0x39   : > { %s2833_s11 = scalar_select %p45_p7, %s2647_s15, %s47_s2  }
  0x3a   : > { %p2835_p11 = por %p55_p9, %p54_p8  ;;  %p2841_p12 = por %p61_p1, %p60_p10 }
  0x3b   : > { %3354 = sst [smem:[#allocation28_spill]] %s2833_s11  ;;  %p326_p0 = scmp.eq.s32.totalorder %s3331_s25, 1 }
  0x3c   : > { %p2181_p2 = scmp.lt.s32.totalorder %s2651_s16, 2  ;;  %s494_s23 = sand.u32 1, %s2647_s15  }
  0x3d   : > { %p2850_p4 = por %p320_p13, %p54_p8  ;;  %p2854_p6 = por %p326_p0, %p60_p10 }
  0x3e   : > { %s2858_s17 = sshll.u32 %s494_s23, 3  ;;  %s2076_s3 = sshll.u32 %s2651_s16, 3 }
  0x3f   : > { %s3359_s0 = sld [smem:[#allocation29_spill]]  ;;  %s498_s22 = scalar_lea.vmem [#allocation2], %s2858_s17 }
  0x40   : > { %s506_s9 = sshll.u32 %s498_s22, 4  ;;  %p2867_p7 = pnand %p2181_p2, %p2835_p11  ;;  %s507_s9 = int_to_ptr.vmem [resolvable:$true] %s506_s9 }
  0x41   : > { %s3361_s1 = sld [smem:[#allocation30_spill]]  ;;  %s513_s6 = sand.u32 1, %s2651_s16  }
  0x42   : > { %s495_s8 = scalar_lea.sflag [#allocation3], %s494_s23  ;;  %p2449_p9 = pneg %p2867_p7 }
  0x45   : > { %s502_s18 = scalar_lea.hbm %s3359_s0, %s2076_s3  ;;  %s2452_s22 = scalar_lea.hbm %s3359_s0, 16 }
  0x46   : > { %s504_s24 = sshll.u32 %s502_s18, 4  ;;  %s505_s24 = int_to_ptr.hbm [resolvable:$true] %s504_s24 }
  0x47   : > { %s521_s4 = scalar_lea.hbm %s3361_s1, %s2076_s3  ;;  %s2445_s5 = sshra.s32 %s505_s24, 4  ;;  %s2446_s5 = int_to_ptr.hbm [resolvable:$true] %s2445_s5 }
  0x48   : > { %s2447_s14 = scalar_lea.hbm %s2446_s5, 8  ;;  %p2453_p13 = scmp.lt.s32.totalorder %s2446_s5, %s3359_s0 }
  0x49   : > { %p2448_p8 = scmp.ne.s32.totalorder %s2446_s5, %s2447_s14  ;;  %p2454_p0 = scmp.lt.s32.totalorder %s2452_s22, %s2447_s14 }
  0x4b   : > { %p2450_p10 = pnand %p2449_p9, %p2448_p8  ;;  %p2455_p2 = por %p2454_p0, %p2453_p13 }
  0x4d   : > { %p2451_p11 = pneg %p2450_p10 }
  0x4f   : > { %p2456_p5 = pnand %p2455_p2, %p2451_p11 }
  0x51   : > { %2459 = shalt.err (!%p2456_p5)
}
  0x52   : > { %2161 = dma.hbm_to_vmem [thread:$0]  (!%p2867_p7), %s505_s24, 128, %s507_s9, %s495_s8  }
  0x53   : > { %s523_s23 = sshll.u32 %s521_s4, 4  ;;  %s517_s3 = scalar_lea.vmem [#allocation5], %s2858_s17  ;;  %s524_s23 = int_to_ptr.hbm [resolvable:$true] %s523_s23 }
  0x54   : > { %s525_s10 = sshll.u32 %s517_s3, 4  ;;  %s514_s12 = scalar_lea.sflag [#allocation6], %s513_s6  ;;  %s526_s10 = int_to_ptr.vmem [resolvable:$true] %s525_s10 }
  0x55   : > { %s2475_s18 = sshra.s32 %s524_s23, 4  ;;  %s2482_s22 = scalar_lea.hbm %s3361_s1, 16  ;;  %s2476_s18 = int_to_ptr.hbm [resolvable:$true] %s2475_s18 }
  0x56   : > { %s2477_s11 = scalar_lea.hbm %s2476_s18, 8  ;;  %p2483_p5 = scmp.lt.s32.totalorder %s2476_s18, %s3361_s1 }
  0x57   : > { %p2478_p8 = scmp.ne.s32.totalorder %s2476_s18, %s2477_s11  ;;  %p2484_p13 = scmp.lt.s32.totalorder %s2482_s22, %s2477_s11 }
  0x59   : > { %p2480_p10 = pnand %p2478_p8, %p2449_p9  ;;  %p2485_p0 = por %p2484_p13, %p2483_p5 }
  0x5b   : > { %p2481_p11 = pneg %p2480_p10 }
  0x5d   : > { %p2486_p2 = pnand %p2485_p0, %p2481_p11 }
  0x5f   : > { %2489 = shalt.err (!%p2486_p2)
}
  0x60   : > { %2164 = dma.hbm_to_vmem [thread:$0]  (!%p2867_p7), %s524_s23, 128, %s526_s10, %s514_s12  }
  0x61   : > { %534 = sbr.rel (%p2780_p3) target bundleno = 3193 (0xc79), region = 68  ;;  %s2903_s4 = sand.u32 (!%p2780_p3), 1, %s2643_s30  }
  0x62   : > { %s2906_s6 = sshll.u32 (!%p2780_p3), %s2903_s4, 3  ;;  %s537_s17 = scalar_lea.sflag (!%p2780_p3), [#allocation3], %s2903_s4 }
  0x63   : > { %s540_s11 = scalar_lea.vmem (!%p2780_p3), [#allocation2], %s2906_s6 }
  0x66   : > { %2606 = dma.done.wait (%p2841_p12), %s537_s17, 128  }
  0x67   : > { %2608 = vsyncadd (%p2841_p12), %s537_s17, 4294967168  ;;  %s546_s10 = sand.u32 1, %s2775_s20   ;;  %s550_s9 = scalar_lea.vmem [#allocation5], %s2906_s6 }
  0x68   : > { %s547_s21 = scalar_lea.sflag [#allocation6], %s546_s10 }
  0x69   : > { %2610 = dma.done.wait (%p2841_p12), %s547_s21, 128  }
  0x6a   : > { %2612 = vsyncadd (%p2841_p12), %s547_s21, 4294967168 }
  0x6b   : > { %2614 = dma.done.wait (%p61_p1), [#allocation6], 12288  }
  0x6c   : > { %2616 = vsyncadd (%p61_p1), [#allocation6], 4294955008 }
  0x6d   : > { %2618 = dma.done.wait (%p61_p1), [#allocation9], 4192  }
  0x6e   : > { %2620 = vsyncadd (%p61_p1), [#allocation9], 4294963104 }
  0x6f   : > { %2622 = dma.done.wait (%p61_p1), [#allocation12], 12288  }
  0x70   : > { %2624 = vsyncadd (%p61_p1), [#allocation12], 4294955008 }
  0x71   : > { %2626 = dma.done.wait (%p61_p1), [#allocation15], 2048  }
  0x72   : > { %2628 = vsyncadd (%p61_p1), [#allocation15], 4294965248  ;;  %v709_v0 = vld [vmem:[#allocation11 + $0x1e8] sm:$0xff]  ;;  %v708_v2 = vld [vmem:[#allocation11 + $0x1e0] sm:$0xff]  ;;  %vm940_vm1 = vcmask 64512   ;;  %s3362_s23 = sld [smem:[#allocation34_spill]] }
  0x73   : > { %v705_v1 = vld [vmem:[#allocation11 + $0x1c8] sm:$0xff]  ;;  %742 = vmatpush.msra.mxu1 %v709_v0  ;;  %722 = vmatpush.msra.mxu0 %v708_v2  ;;  %v704_v3 = vld [vmem:[#allocation11 + $0x1c0] sm:$0xff]  ;;  %v845_v35 = vld [vmem:[#allocation7 + $0x158] sm:$0xff]  ;;  %s3363_s18 = sld [smem:[#allocation37_spill]]  ;;  %vm956_vm2 = vcmask 1047556   ;;  %s2669_s5 = smov 8  }
  0x74   : > { %v701_v4 = vld [vmem:[#allocation11 + $0x1a8] sm:$0xff]  ;;  %v700_v5 = vld [vmem:[#allocation11 + $0x1a0] sm:$0xff]  ;;  %v841_v38 = vld [vmem:[#allocation7 + $0x138] sm:$0xff]  ;;  %s2670_s14 = smov 32   ;;  %s2671_s22 = smov 48   ;;  %vm1023_vm3 = vcmask 130048  }
  0x75   : > { %743 = vmatpush.msra.mxu1 %v705_v1  ;;  %723 = vmatpush.msra.mxu0 %v704_v3  ;;  %v697_v6 = vld [vmem:[#allocation11 + $0x188] sm:$0xff]  ;;  %v696_v7 = vld [vmem:[#allocation11 + $0x180] sm:$0xff]  ;;  %v833_v43 = vld [vmem:[#allocation7 + $0xf8] sm:$0xff]  ;;  %s2672_s25 = smov 16   ;;  %s2673_s8 = smov 40   ;;  %vm1025_vm4 = vcmask 195584  }
  0x76   : > { %v693_v8 = vld [vmem:[#allocation11 + $0x168] sm:$0xff]  ;;  %v692_v9 = vld [vmem:[#allocation11 + $0x160] sm:$0xff]  ;;  %v829_v46 = vld [vmem:[#allocation7 + $0xd8] sm:$0xff]  ;;  %s2674_s17 = smov 56   ;;  %vm1027_vm5 = vcmask 261120   ;;  %vm1029_vm6 = vcmask 326656  }
  0x77   : > { %744 = vmatpush.msra.mxu1 %v701_v4  ;;  %724 = vmatpush.msra.mxu0 %v700_v5  ;;  %v689_v10 = vld [vmem:[#allocation11 + $0x148] sm:$0xff]  ;;  %v688_v11 = vld [vmem:[#allocation11 + $0x140] sm:$0xff]  ;;  %v821_v51 = vld [vmem:[#allocation7 + $0x98] sm:$0xff]  ;;  %vm1031_vm7 = vcmask 392192   ;;  %vm1033_vm8 = vcmask 457728   ;;  %s2089_s27 = sshll.u32 %s2903_s4, 1 }
  0x78   : > { %v685_v12 = vld [vmem:[#allocation11 + $0x128] sm:$0xff]  ;;  %v684_v13 = vld [vmem:[#allocation11 + $0x120] sm:$0xff]  ;;  %v817_v54 = vld [vmem:[#allocation7 + $0x78] sm:$0xff]  ;;  %vm1035_vm9 = vcmask 523264   ;;  %vm1791_vm10 = vcmask 1040384   ;;  %s3215_s24 = scalar_lea.vmem [#allocation19], %s2089_s27 }
  0x79   : > { %745 = vmatpush.msra.mxu1 %v697_v6  ;;  %725 = vmatpush.msra.mxu0 %v696_v7  ;;  %v681_v14 = vld [vmem:[#allocation11 + $0x108] sm:$0xff]  ;;  %v680_v15 = vld [vmem:[#allocation11 + $0x100] sm:$0xff]  ;;  %v809_v59 = vld [vmem:[#allocation7 + $0x38] sm:$0xff]  ;;  %s633_s19 = scalar_lea.vmem [#allocation17], %s2089_s27  ;;  %s2101_s12 = sshll.u32 %s2775_s20, 1 }
  0x7a   : > { %v677_v16 = vld [vmem:[#allocation11 + $0xe8] sm:$0xff]  ;;  %v676_v17 = vld [vmem:[#allocation11 + $0xe0] sm:$0xff]  ;;  %v805_v62 = vld [vmem:[#allocation7 + $0x18] sm:$0xff]  ;;  %s3247_s2 = scalar_lea.sflag [#allocation18], %s546_s10 }
  0x7b   : > { %746 = vmatpush.msra.mxu1 %v693_v8  ;;  %726 = vmatpush.msra.mxu0 %v692_v9  ;;  %v673_v18 = vld [vmem:[#allocation11 + $0xc8] sm:$0xff]  ;;  %v672_v19 = vld [vmem:[#allocation11 + $0xc0] sm:$0xff]  ;;  %v2953_v2 = vld [vmem:[%s3318_s7] sm:$0xf] }
  0x7c   : > { %v669_v20 = vld [vmem:[#allocation11 + $0xa8] sm:$0xff]  ;;  %v668_v21 = vld [vmem:[#allocation11 + $0xa0] sm:$0xff]  ;;  %v715_v3 = vperm.slane %v2953_v2, 1  ;;  %v2956_v7 = vld [vmem:[#allocation8] sm:$0x7]  ;;  %v714_v9 = vperm.slane %v2953_v2, 0 }
  0x7d   : > { %747 = vmatpush.msra.mxu1 %v689_v10  ;;  %727 = vmatpush.msra.mxu0 %v688_v11  ;;  %v665_v22 = vld [vmem:[#allocation11 + $0x88] sm:$0xff]  ;;  %v664_v23 = vld [vmem:[#allocation11 + $0x80] sm:$0xff]  ;;  %v853_v8 = vperm.slane %v2956_v7, 1  ;;  %v852_v10 = vperm.slane %v2956_v7, 0 }
  0x7e   : > { %v661_v24 = vld [vmem:[#allocation11 + $0x68] sm:$0xff]  ;;  %v660_v25 = vld [vmem:[#allocation11 + $0x60] sm:$0xff] }
  0x7f   : > { %748 = vmatpush.msra.mxu1 %v685_v12  ;;  %728 = vmatpush.msra.mxu0 %v684_v13  ;;  %v657_v26 = vld [vmem:[#allocation11 + $0x48] sm:$0xff]  ;;  %v656_v27 = vld [vmem:[#allocation11 + $0x40] sm:$0xff] }
  0x80   : > { %v653_v28 = vld [vmem:[#allocation11 + $0x28] sm:$0xff]  ;;  %v652_v29 = vld [vmem:[#allocation11 + $0x20] sm:$0xff] }
  0x81   : > { %749 = vmatpush.msra.mxu1 %v681_v14  ;;  %729 = vmatpush.msra.mxu0 %v680_v15  ;;  %v649_v30 = vld [vmem:[#allocation11 + $0x8] sm:$0xff]  ;;  %v648_v31 = vld [vmem:[#allocation11] sm:$0xff] }
  0x82   : > { %v848_v32 = vld [vmem:[#allocation7 + $0x170] sm:$0xff]  ;;  %v847_v33 = vld [vmem:[#allocation7 + $0x168] sm:$0xff]  ;;  %v842_v37 = vld [vmem:[#allocation7 + $0x140] sm:$0xff] }
  0x83   : > { %750 = vmatpush.msra.mxu1 %v677_v16  ;;  %730 = vmatpush.msra.mxu0 %v676_v17  ;;  %v2940_v34 = vld [vmem:[%s550_s9] sm:$0xff]  ;;  %v839_v39 = vld [vmem:[#allocation7 + $0x128] sm:$0xff]  ;;  %v838_v40 = vld [vmem:[#allocation7 + $0x120] sm:$0xff]  ;;  %s2675_s9 = smov 24  }
  0x84   : > { %v844_v36 = vld [vmem:[#allocation7 + $0x150] sm:$0xff]  ;;  %v835_v42 = vld [vmem:[#allocation7 + $0x108] sm:$0xff]  ;;  %v830_v45 = vld [vmem:[#allocation7 + $0xe0] sm:$0xff] }
  0x85   : > { %751 = vmatpush.msra.mxu1 %v673_v18  ;;  %731 = vmatpush.msra.mxu0 %v672_v19  ;;  %v836_v41 = vld [vmem:[#allocation7 + $0x110] sm:$0xff]  ;;  %v827_v47 = vld [vmem:[#allocation7 + $0xc8] sm:$0xff]  ;;  %v826_v48 = vld [vmem:[#allocation7 + $0xc0] sm:$0xff] }
  0x86   : > { %v832_v44 = vld [vmem:[#allocation7 + $0xf0] sm:$0xff]  ;;  %v823_v50 = vld [vmem:[#allocation7 + $0xa8] sm:$0xff]  ;;  %v818_v53 = vld [vmem:[#allocation7 + $0x80] sm:$0xff] }
  0x87   : > { %752 = vmatpush.msra.mxu1 %v669_v20  ;;  %732 = vmatpush.msra.mxu0 %v668_v21  ;;  %v824_v49 = vld [vmem:[#allocation7 + $0xb0] sm:$0xff]  ;;  %v815_v55 = vld [vmem:[#allocation7 + $0x68] sm:$0xff]  ;;  %v814_v56 = vld [vmem:[#allocation7 + $0x60] sm:$0xff] }
  0x88   : > { %v820_v52 = vld [vmem:[#allocation7 + $0x90] sm:$0xff]  ;;  %v811_v58 = vld [vmem:[#allocation7 + $0x48] sm:$0xff]  ;;  %v806_v61 = vld [vmem:[#allocation7 + $0x20] sm:$0xff] }
  0x89   : > { %753 = vmatpush.msra.mxu1 %v665_v22  ;;  %733 = vmatpush.msra.mxu0 %v664_v23  ;;  %v812_v57 = vld [vmem:[#allocation7 + $0x50] sm:$0xff]  ;;  %v803_v63 = vld [vmem:[#allocation7 + $0x8] sm:$0xff]  ;;  %v802_v0 = vld [vmem:[#allocation7] sm:$0xff] }
  0x8a   : > { %v808_v60 = vld [vmem:[#allocation7 + $0x30] sm:$0xff]  ;;  %v2946_v1 = vld [vmem:[%s540_s11] sm:$0xff] }
  0x8b   : > { %754 = vmatpush.msra.mxu1 %v661_v24  ;;  %734 = vmatpush.msra.mxu0 %v660_v25  ;;  %v710_v16 = vld [vmem:[#allocation11 + $0x1f0] sm:$0xff] }
  0x8c   : > { %v706_v17 = vld [vmem:[#allocation11 + $0x1d0] sm:$0xff]  ;;  %762 = vmatpush.msra.mxu2 %v710_v16  ;;  %v671_v16 = vld [vmem:[#allocation11 + $0xb8] sm:$0xff] }
  0x8d   : > { %755 = vmatpush.msra.mxu1 %v657_v26  ;;  %735 = vmatpush.msra.mxu0 %v656_v27  ;;  %v702_v18 = vld [vmem:[#allocation11 + $0x1b0] sm:$0xff]  ;;  %v643_v27 = vlaneseq }
  0x8e   : > { %763 = vmatpush.msra.mxu2 %v706_v17  ;;  %v698_v19 = vld [vmem:[#allocation11 + $0x190] sm:$0xff] }
  0x8f   : > { %756 = vmatpush.msra.mxu1 %v653_v28  ;;  %736 = vmatpush.msra.mxu0 %v652_v29  ;;  %v694_v20 = vld [vmem:[#allocation11 + $0x170] sm:$0xff] }
  0x90   : > { %764 = vmatpush.msra.mxu2 %v702_v18  ;;  %v690_v21 = vld [vmem:[#allocation11 + $0x150] sm:$0xff] }
  0x91   : > { %757 = vmatpush.msra.mxu1 %v649_v30  ;;  %737 = vmatpush.msra.mxu0 %v648_v31  ;;  %v686_v22 = vld [vmem:[#allocation11 + $0x130] sm:$0xff]  ;;  %v2961_v30 = vshrl.u32 %v643_v27, 7  ;;  %v2963_v31 = vand.u32 127, %v643_v27  ;;  %v659_v27 = vld [vmem:[#allocation11 + $0x58] sm:$0xff] }
  0x92   : > { %758 = vmatmul.f32.vlgmr.msra.gmra.mxu1 %v2940_v34  ;;  %738 = vmatmul.f32.vlgmr.msra.gmra.mxu0 %v2940_v34  ;;  %v682_v23 = vld [vmem:[#allocation11 + $0x110] sm:$0xff] }
  0x93   : > { %878 = vmatpush.msrb.mxu1 %v848_v32  ;;  %858 = vmatpush.msrb.mxu0 %v847_v33  ;;  %v678_v24 = vld [vmem:[#allocation11 + $0xf0] sm:$0xff]  ;;  %vm647_vm0 = vcmp.le.s32.totalorder %v2963_v31, %v2961_v30 }
  0x94   : > { %765 = vmatpush.msra.mxu2 %v698_v19  ;;  %v674_v25 = vld [vmem:[#allocation11 + $0xd0] sm:$0xff]  ;;  %v1238_v19 = vld [vmem:[#allocation13 + $0x20] sm:$0xff] }
  0x95   : > { %879 = vmatpush.msrb.mxu1 %v845_v35  ;;  %859 = vmatpush.msrb.mxu0 %v844_v36  ;;  %v670_v26 = vld [vmem:[#allocation11 + $0xb0] sm:$0xff] }
  0x96   : > { %766 = vmatpush.msra.mxu2 %v694_v20  ;;  %v666_v28 = vld [vmem:[#allocation11 + $0x90] sm:$0xff]  ;;  %v667_v20 = vld [vmem:[#allocation11 + $0x98] sm:$0xff] }
  0x97   : > { %880 = vmatpush.msrb.mxu1 %v842_v37  ;;  %860 = vmatpush.msrb.mxu0 %v841_v38  ;;  %v662_v29 = vld [vmem:[#allocation11 + $0x70] sm:$0xff] }
  0x98   : > { %767 = vmatpush.msra.mxu2 %v690_v21  ;;  %v658_v32 = vld [vmem:[#allocation11 + $0x50] sm:$0xff] }
  0x99   : > { %881 = vmatpush.msrb.mxu1 %v839_v39  ;;  %861 = vmatpush.msrb.mxu0 %v838_v40  ;;  %v654_v33 = vld [vmem:[#allocation11 + $0x30] sm:$0xff] }
  0x9a   : > { %768 = vmatpush.msra.mxu2 %v686_v22  ;;  %v650_v37 = vld [vmem:[#allocation11 + $0x10] sm:$0xff]  ;;  %v1237_v22 = vld [vmem:[#allocation13 + $0x18] sm:$0xff] }
  0x9b   : > { %882 = vmatpush.msrb.mxu1 %v836_v41  ;;  %862 = vmatpush.msrb.mxu0 %v835_v42  ;;  %v849_v38 = vld [vmem:[#allocation7 + $0x178] sm:$0xff]  ;;  %v846_v41 = vld [vmem:[#allocation7 + $0x160] sm:$0xff]  ;;  %v843_v42 = vld [vmem:[#allocation7 + $0x148] sm:$0xff] }
  0x9c   : > { %769 = vmatpush.msra.mxu2 %v682_v23  ;;  %v1236_v23 = vld [vmem:[#allocation13 + $0x10] sm:$0xff] }
  0x9d   : > { %883 = vmatpush.msrb.mxu1 %v833_v43  ;;  %863 = vmatpush.msrb.mxu0 %v832_v44  ;;  %v840_v43 = vld [vmem:[#allocation7 + $0x130] sm:$0xff]  ;;  %v837_v44 = vld [vmem:[#allocation7 + $0x118] sm:$0xff] }
  0x9e   : > { %770 = vmatpush.msra.mxu2 %v678_v24 }
  0x9f   : > { %884 = vmatpush.msrb.mxu1 %v830_v45  ;;  %864 = vmatpush.msrb.mxu0 %v829_v46  ;;  %v834_v45 = vld [vmem:[#allocation7 + $0x100] sm:$0xff]  ;;  %v831_v46 = vld [vmem:[#allocation7 + $0xe8] sm:$0xff] }
  0xa0   : > { %771 = vmatpush.msra.mxu2 %v674_v25 }
  0xa1   : > { %885 = vmatpush.msrb.mxu1 %v827_v47  ;;  %865 = vmatpush.msrb.mxu0 %v826_v48  ;;  %v828_v47 = vld [vmem:[#allocation7 + $0xd0] sm:$0xff]  ;;  %v825_v48 = vld [vmem:[#allocation7 + $0xb8] sm:$0xff] }
  0xa2   : > { %772 = vmatpush.msra.mxu2 %v670_v26  ;;  %v663_v26 = vld [vmem:[#allocation11 + $0x78] sm:$0xff] }
  0xa3   : > { %886 = vmatpush.msrb.mxu1 %v824_v49  ;;  %866 = vmatpush.msrb.mxu0 %v823_v50  ;;  %v822_v49 = vld [vmem:[#allocation7 + $0xa0] sm:$0xff]  ;;  %v819_v50 = vld [vmem:[#allocation7 + $0x88] sm:$0xff] }
  0xa4   : > { %773 = vmatpush.msra.mxu2 %v666_v28  ;;  %v716_v28 = vperm.slane %v2953_v2, 2 }
  0xa5   : > { %887 = vmatpush.msrb.mxu1 %v821_v51  ;;  %867 = vmatpush.msrb.mxu0 %v820_v52  ;;  %v816_v51 = vld [vmem:[#allocation7 + $0x70] sm:$0xff]  ;;  %v813_v52 = vld [vmem:[#allocation7 + $0x58] sm:$0xff] }
  0xa6   : > { %774 = vmatpush.msra.mxu2 %v662_v29  ;;  %v1235_v29 = vld [vmem:[#allocation13 + $0x8] sm:$0xff] }
  0xa7   : > { %888 = vmatpush.msrb.mxu1 %v818_v53  ;;  %868 = vmatpush.msrb.mxu0 %v817_v54  ;;  %v810_v53 = vld [vmem:[#allocation7 + $0x40] sm:$0xff]  ;;  %v807_v54 = vld [vmem:[#allocation7 + $0x28] sm:$0xff] }
  0xa8   : > { %775 = vmatpush.msra.mxu2 %v658_v32 }
  0xa9   : > { %889 = vmatpush.msrb.mxu1 %v815_v55  ;;  %869 = vmatpush.msrb.mxu0 %v814_v56  ;;  %v804_v55 = vld [vmem:[#allocation7 + $0x10] sm:$0xff]  ;;  %v1249_v56 = vld [vmem:[#allocation13 + $0x78] sm:$0xff] }
  0xaa   : > { %776 = vmatpush.msra.mxu2 %v654_v33  ;;  %v655_v33 = vld [vmem:[#allocation11 + $0x38] sm:$0xff] }
  0xab   : > { %890 = vmatpush.msrb.mxu1 %v812_v57  ;;  %870 = vmatpush.msrb.mxu0 %v811_v58  ;;  %v1248_v57 = vld [vmem:[#allocation13 + $0x70] sm:$0xff]  ;;  %v711_v58 = vld [vmem:[#allocation11 + $0x1f8] sm:$0xff] }
  0xac   : > { %777 = vmatpush.msra.mxu2 %v650_v37  ;;  %782 = vmatpush.msra.mxu3 %v711_v58  ;;  %v651_v37 = vld [vmem:[#allocation11 + $0x18] sm:$0xff]  ;;  %v1063_v58 = vld [vmem:[#allocation10 + $0x10] sm:$0xff] }
  0xad   : > { %891 = vmatpush.msrb.mxu1 %v809_v59  ;;  %871 = vmatpush.msrb.mxu0 %v808_v60  ;;  %v707_v59 = vld [vmem:[#allocation11 + $0x1d8] sm:$0xff]  ;;  %v1247_v60 = vld [vmem:[#allocation13 + $0x68] sm:$0xff] }
  0xae   : > { %898 = vmatpush.msrb.mxu2 %v849_v38  ;;  %783 = vmatpush.msra.mxu3 %v707_v59  ;;  %v854_v38 = vperm.slane %v2956_v7, 2  ;;  %v1062_v59 = vld [vmem:[#allocation10 + $0x8] sm:$0xff] }
  0xaf   : > { %892 = vmatpush.msrb.mxu1 %v806_v61  ;;  %872 = vmatpush.msrb.mxu0 %v805_v62  ;;  %v703_v61 = vld [vmem:[#allocation11 + $0x1b8] sm:$0xff]  ;;  %v1246_v62 = vld [vmem:[#allocation13 + $0x60] sm:$0xff] }
  0xb0   : > { %778 = vmatmul.f32.vlgmr.msra.gmra.mxu2 %v2940_v34  ;;  %784 = vmatpush.msra.mxu3 %v703_v61 }
  0xb1   : > { %893 = vmatpush.msrb.mxu1 %v803_v63  ;;  %873 = vmatpush.msrb.mxu0 %v802_v0  ;;  %v699_v63 = vld [vmem:[#allocation11 + $0x198] sm:$0xff] }
  0xb2   : > { %894 = vmatmul.f32.vlgmr.msrb.gmra.mxu1 %v2946_v1  ;;  %874 = vmatmul.f32.vlgmr.msrb.gmra.mxu0 %v2946_v1  ;;  %v1245_v0 = vld [vmem:[#allocation13 + $0x58] sm:$0xff] }
  0xb3   : > { %899 = vmatpush.msrb.mxu2 %v846_v41  ;;  %785 = vmatpush.msra.mxu3 %v699_v63  ;;  %v1076_v41 = vld [vmem:[#allocation10 + $0x78] sm:$0xff] }
  0xb5   : > { %900 = vmatpush.msrb.mxu2 %v843_v42  ;;  %v1075_v42 = vld [vmem:[#allocation10 + $0x70] sm:$0xff] }
  0xb7   : > { %901 = vmatpush.msrb.mxu2 %v840_v43  ;;  %v1074_v43 = vld [vmem:[#allocation10 + $0x68] sm:$0xff] }
  0xb9   : > { %902 = vmatpush.msrb.mxu2 %v837_v44  ;;  %v1073_v44 = vld [vmem:[#allocation10 + $0x60] sm:$0xff] }
  0xbb   : > { %903 = vmatpush.msrb.mxu2 %v834_v45  ;;  %v1072_v45 = vld [vmem:[#allocation10 + $0x58] sm:$0xff] }
  0xbd   : > { %904 = vmatpush.msrb.mxu2 %v831_v46  ;;  %v1071_v46 = vld [vmem:[#allocation10 + $0x50] sm:$0xff] }
  0xbf   : > { %905 = vmatpush.msrb.mxu2 %v828_v47  ;;  %v1070_v47 = vld [vmem:[#allocation10 + $0x48] sm:$0xff] }
  0xc1   : > { %906 = vmatpush.msrb.mxu2 %v825_v48  ;;  %v1069_v48 = vld [vmem:[#allocation10 + $0x40] sm:$0xff] }
  0xc3   : > { %907 = vmatpush.msrb.mxu2 %v822_v49  ;;  %v1067_v49 = vld [vmem:[#allocation10 + $0x30] sm:$0xff] }
  0xc5   : > { %908 = vmatpush.msrb.mxu2 %v819_v50 }
  0xc7   : > { %909 = vmatpush.msrb.mxu2 %v816_v51 }
  0xc9   : > { %910 = vmatpush.msrb.mxu2 %v813_v52 }
  0xcb   : > { %911 = vmatpush.msrb.mxu2 %v810_v53 }
  0xcd   : > { %912 = vmatpush.msrb.mxu2 %v807_v54 }
  0xcf   : > { %913 = vmatpush.msrb.mxu2 %v804_v55  ;;  %v1066_v55 = vld [vmem:[#allocation10 + $0x28] sm:$0xff] }
  0xd0   : > { %914 = vmatmul.f32.vlgmr.msrb.gmra.mxu2 %v2946_v1 }
  0xd1   : > { %1254 = vmatpush.msra.mxu2 %v1249_v56  ;;  %v1065_v56 = vld [vmem:[#allocation10 + $0x20] sm:$0xff] }
  0xd3   : > { %1255 = vmatpush.msra.mxu2 %v1248_v57  ;;  %v1064_v57 = vld [vmem:[#allocation10 + $0x18] sm:$0xff] }
  0xd5   : > { %1256 = vmatpush.msra.mxu2 %v1247_v60  ;;  %v1061_v60 = vld [vmem:[#allocation10] sm:$0xff] }
  0xd7   : > { %1257 = vmatpush.msra.mxu2 %v1246_v62 }
  0xd9   : > { %1258 = vmatpush.msra.mxu2 %v1245_v0  ;;  %v2244_v0 = vld [vmem:[%s3362_s23] ss:$0 sm:$0xff] }
 0x10f   : > { %v759_v4 = vpop.f32.mrf.mxu1  ;;  %v739_v6 = vpop.f32.mrf.mxu0 }
 0x110   : > { %v760_v5 = vadd.f32 %v759_v4, %v715_v3  ;;  %v740_v14 = vadd.f32 %v739_v6, %v714_v9  ;;  %v695_v3 = vld [vmem:[#allocation11 + $0x178] sm:$0xff]  ;;  %v1244_v4 = vld [vmem:[#allocation13 + $0x50] sm:$0xff]  ;;  %v1243_v6 = vld [vmem:[#allocation13 + $0x48] sm:$0xff] }
 0x111   : > { %786 = vmatpush.msra.mxu3 %v695_v3  ;;  %1259 = vmatpush.msra.mxu2 %v1244_v4  ;;  %v1242_v9 = vld [vmem:[#allocation13 + $0x40] sm:$0xff] }
 0x112   : > { %1228 = vmatpush.msra.mxu1 %v760_v5  ;;  %v691_v5 = vld [vmem:[#allocation11 + $0x158] sm:$0xff] }
 0x113   : > { %787 = vmatpush.msra.mxu3 %v691_v5  ;;  %1260 = vmatpush.msra.mxu2 %v1243_v6 }
 0x115   : > { %1261 = vmatpush.msra.mxu2 %v1242_v9 }
 0x12f   : > { %v895_v11 = vpop.f32.mrf.mxu1  ;;  %v875_v12 = vpop.f32.mrf.mxu0 }
 0x130   : > { %v896_v13 = vadd.f32 %v895_v11, %v853_v8  ;;  %v876_v15 = vadd.f32 %v875_v12, %v852_v10  ;;  %v687_v8 = vld [vmem:[#allocation11 + $0x138] sm:$0xff] }
 0x131   : > { %v683_v10 = vld [vmem:[#allocation11 + $0x118] sm:$0xff]  ;;  %788 = vmatpush.msra.mxu3 %v687_v8 }
 0x132   : > { %933 = vmatpush.xpose.msra.mxu0 %v896_v13  ;;  %v1241_v11 = vld [vmem:[#allocation13 + $0x38] sm:$0xff]  ;;  %v1240_v13 = vld [vmem:[#allocation13 + $0x30] sm:$0xff] }
 0x133   : > { %v679_v12 = vld [vmem:[#allocation11 + $0xf8] sm:$0xff]  ;;  %789 = vmatpush.msra.mxu3 %v683_v10  ;;  %1262 = vmatpush.msra.mxu2 %v1241_v11  ;;  %v779_v32 = vpop.f32.mrf.mxu2 }
 0x135   : > { %934 = vmatmul.f32.vlgmr.msra.gmra.mxu0 %v876_v15  ;;  %790 = vmatpush.msra.mxu3 %v679_v12  ;;  %v1239_v15 = vld [vmem:[#allocation13 + $0x28] sm:$0xff] }
 0x136   : > { %1116 = vmatpush.xpose.msrb.mxu0 %v740_v14  ;;  %v675_v14 = vld [vmem:[#allocation11 + $0xd8] sm:$0xff]  ;;  %1263 = vmatpush.msra.mxu2 %v1240_v13 }
 0x137   : > { %791 = vmatpush.msra.mxu3 %v675_v14 }
 0x138   : > { %1264 = vmatpush.msra.mxu2 %v1239_v15 }
 0x139   : > { %792 = vmatpush.msra.mxu3 %v671_v16 }
 0x13a   : > { %1265 = vmatpush.msra.mxu2 %v1238_v19  ;;  %v1322_v19 = vld [vmem:[#allocation7 + $0x2e8] sm:$0xff] }
 0x13b   : > { %793 = vmatpush.msra.mxu3 %v667_v20  ;;  %v1323_v20 = vld [vmem:[#allocation7 + $0x2f0] sm:$0xff]  ;;  %1334 = vmatpush.msra.mxu0 %v1322_v19 }
 0x13c   : > { %1266 = vmatpush.msra.mxu2 %v1237_v22  ;;  %1354 = vmatpush.msrb.mxu1 %v1323_v20  ;;  %v1319_v22 = vld [vmem:[#allocation7 + $0x2d0] sm:$0xff] }
 0x13d   : > { %794 = vmatpush.msra.mxu3 %v663_v26  ;;  %v1317_v26 = vld [vmem:[#allocation7 + $0x2c0] sm:$0xff]  ;;  %1335 = vmatpush.msra.mxu0 %v1319_v22 }
 0x13e   : > { %1267 = vmatpush.msra.mxu2 %v1236_v23  ;;  %v1320_v23 = vld [vmem:[#allocation7 + $0x2d8] sm:$0xff] }
 0x13f   : > { %795 = vmatpush.msra.mxu3 %v659_v27  ;;  %1355 = vmatpush.msrb.mxu1 %v1320_v23  ;;  %v1318_v27 = vld [vmem:[#allocation7 + $0x2c8] sm:$0xff] }
 0x140   : > { %1268 = vmatpush.msra.mxu2 %v1235_v29  ;;  %v1314_v29 = vld [vmem:[#allocation7 + $0x2a8] sm:$0xff] }
 0x141   : > { %796 = vmatpush.msra.mxu3 %v655_v33  ;;  %1356 = vmatpush.msrb.mxu1 %v1317_v26  ;;  %v1310_v33 = vld [vmem:[#allocation7 + $0x288] sm:$0xff] }
 0x143   : > { %797 = vmatpush.msra.mxu3 %v651_v37  ;;  %1357 = vmatpush.msrb.mxu1 %v1314_v29  ;;  %v1307_v37 = vld [vmem:[#allocation7 + $0x270] sm:$0xff] }
 0x144   : > { %798 = vmatmul.f32.vlgmr.msra.gmra.mxu3 %v2940_v34  ;;  %v1068_v34 = vld [vmem:[#allocation10 + $0x38] sm:$0xff] }
 0x1b2   : > { %v935_v35 = vpop.f32.mrf.mxu0 }
 0x1b3   : > { %v938_v36 = vmul.f32 0.17677669, %v935_v35  ;;  %v780_v35 = vadd.f32 %v779_v32, %v716_v28  ;;  %v1313_v28 = vld [vmem:[#allocation7 + $0x2a0] sm:$0xff]  ;;  %v1315_v32 = vld [vmem:[#allocation7 + $0x2b0] sm:$0xff] }
 0x1b5   : > { %v2970_v39 = vsel %vm647_vm0, %v938_v36, -10000000.0  ;;  %v1234_v36 = vld [vmem:[#allocation13] sm:$0xff] }
 0x1b6   : > { %v941_v40 = vsel %vm940_vm1, %v2970_v39, -inf  ;;  %1269 = vmatpush.msra.mxu2 %v1234_v36  ;;  %v1312_v36 = vld [vmem:[#allocation7 + $0x298] sm:$0xff] }
 0x1b7   : > { %942 = vmax.xlane.f32.xlu0 %v941_v40 }
 0x1b8   : > { %1585 = vmatpush.xpose.msrb.mxu2 %v780_v35  ;;  %v1311_v35 = vld [vmem:[#allocation7 + $0x290] sm:$0xff] }
 0x1b9   : > { %1358 = vmatpush.msrb.mxu1 %v1311_v35 }
 0x1c7   : > { %v2985_v61 = vpop.f32.mrf.mxu3 }
 0x22a   : > { %v943_v17 = vpop.xlane.xlu0 %942 }
 0x22b   : > { %v944_v18 = vsub.f32 %v2970_v39, %v943_v17  ;;  %v915_v39 = vpop.f32.mrf.mxu2 }
 0x22c   : > { %v916_v40 = vadd.f32 %v915_v39, %v854_v38  ;;  %v1308_v38 = vld [vmem:[#allocation7 + $0x278] sm:$0xff]  ;;  %v1309_v39 = vld [vmem:[#allocation7 + $0x280] sm:$0xff] }
 0x22d   : > { %v945_v21 = vmul.f32 1.442695, %v944_v18  ;;  %1359 = vmatpush.msrb.mxu1 %v1308_v38 }
 0x22e   : > { %1055 = vmatpush.msrb.mxu3 %v916_v40  ;;  %v1304_v40 = vld [vmem:[#allocation7 + $0x258] sm:$0xff] }
 0x22f   : > { %2249 = vpow2.f32 %v945_v21  ;;  %v1324_v21 = vld [vmem:[#allocation7 + $0x2f8] sm:$0xff] }
 0x230   : > { %1081 = vmatpush.msra.mxu3 %v1076_v41  ;;  %v1305_v41 = vld [vmem:[#allocation7 + $0x260] sm:$0xff] }
 0x231   : > { %1360 = vmatpush.msrb.mxu1 %v1305_v41  ;;  %v2668_v41 = vmov 1934713408  }
 0x232   : > { %1082 = vmatpush.msra.mxu3 %v1075_v42  ;;  %v1306_v42 = vld [vmem:[#allocation7 + $0x268] sm:$0xff] }
 0x234   : > { %1083 = vmatpush.msra.mxu3 %v1074_v43  ;;  %v1301_v43 = vld [vmem:[#allocation7 + $0x240] sm:$0xff] }
 0x235   : > { %v2250_v24 = vpop.eup %2249 }
 0x236   : > { %v947_v25 = vsel %vm940_vm1, %v2250_v24, 0.0  ;;  %1084 = vmatpush.msra.mxu3 %v1073_v44  ;;  %v1302_v44 = vld [vmem:[#allocation7 + $0x248] sm:$0xff] }
 0x237   : > { %948 = vadd.xlane.f32.xlu0 %v947_v25  ;;  %v1316_v25 = vld [vmem:[#allocation7 + $0x2b8] sm:$0xff]  ;;  %1361 = vmatpush.msrb.mxu1 %v1302_v44 }
 0x238   : > { %1085 = vmatpush.msra.mxu3 %v1072_v45  ;;  %1336 = vmatpush.msra.mxu0 %v1316_v25  ;;  %v1303_v45 = vld [vmem:[#allocation7 + $0x250] sm:$0xff] }
 0x23a   : > { %1086 = vmatpush.msra.mxu3 %v1071_v46  ;;  %1337 = vmatpush.msra.mxu0 %v1313_v28  ;;  %v1298_v46 = vld [vmem:[#allocation7 + $0x228] sm:$0xff] }
 0x23c   : > { %1087 = vmatpush.msra.mxu3 %v1070_v47  ;;  %1338 = vmatpush.msra.mxu0 %v1310_v33  ;;  %v1299_v47 = vld [vmem:[#allocation7 + $0x230] sm:$0xff] }
 0x23d   : > { %1362 = vmatpush.msrb.mxu1 %v1299_v47 }
 0x23e   : > { %1088 = vmatpush.msra.mxu3 %v1069_v48  ;;  %1339 = vmatpush.msra.mxu0 %v1307_v37  ;;  %v1300_v48 = vld [vmem:[#allocation7 + $0x238] sm:$0xff] }
 0x240   : > { %1089 = vmatpush.msra.mxu3 %v1068_v34  ;;  %1340 = vmatpush.msra.mxu0 %v1304_v40  ;;  %v1295_v34 = vld [vmem:[#allocation7 + $0x210] sm:$0xff] }
 0x242   : > { %1090 = vmatpush.msra.mxu3 %v1067_v49  ;;  %1341 = vmatpush.msra.mxu0 %v1301_v43  ;;  %v1297_v49 = vld [vmem:[#allocation7 + $0x220] sm:$0xff] }
 0x244   : > { %1091 = vmatpush.msra.mxu3 %v1066_v55  ;;  %1342 = vmatpush.msra.mxu0 %v1298_v46  ;;  %v1290_v55 = vld [vmem:[#allocation7 + $0x1e8] sm:$0xff] }
 0x246   : > { %1092 = vmatpush.msra.mxu3 %v1065_v56  ;;  %1343 = vmatpush.msra.mxu0 %v1295_v34  ;;  %v1291_v56 = vld [vmem:[#allocation7 + $0x1f0] sm:$0xff] }
 0x248   : > { %1093 = vmatpush.msra.mxu3 %v1064_v57 }
 0x24a   : > { %1094 = vmatpush.msra.mxu3 %v1063_v58 }
 0x24c   : > { %1095 = vmatpush.msra.mxu3 %v1062_v59  ;;  %v1286_v59 = vld [vmem:[#allocation7 + $0x1c8] sm:$0xff] }
 0x24e   : > { %1096 = vmatpush.msra.mxu3 %v1061_v60  ;;  %v1287_v60 = vld [vmem:[#allocation7 + $0x1d0] sm:$0xff] }
 0x2aa   : > { %v949_v7 = vpop.xlane.xlu0 %948 }
 0x2ab   : > { %2251 = vrcp.f32 %v949_v7 }
 0x2b1   : > { %v2252_v50 = vpop.eup %2251 }
 0x2b2   : > { %v951_v51 = vmul.f32 %v2252_v50, %v949_v7  ;;  %v1296_v7 = vld [vmem:[#allocation7 + $0x218] sm:$0xff] }
 0x2b3   : > { %1363 = vmatpush.msrb.mxu1 %v1296_v7 }
 0x2b4   : > { %v952_v52 = vsub.f32 2.0, %v951_v51  ;;  %v1293_v51 = vld [vmem:[#allocation7 + $0x200] sm:$0xff] }
 0x2b5   : > { %1364 = vmatpush.msrb.mxu1 %v1293_v51 }
 0x2b6   : > { %v953_v53 = vmul.f32 %v2252_v50, %v952_v52  ;;  %v1292_v50 = vld [vmem:[#allocation7 + $0x1f8] sm:$0xff]  ;;  %v1294_v52 = vld [vmem:[#allocation7 + $0x208] sm:$0xff] }
 0x2b7   : > { %1344 = vmatpush.msra.mxu0 %v1292_v50  ;;  %1365 = vmatpush.msrb.mxu1 %v1290_v55 }
 0x2b8   : > { %v2981_v54 = vmul.f32 %v2250_v24, %v953_v53  ;;  %v1321_v24 = vld [vmem:[#allocation7 + $0x2e0] sm:$0xff] }
 0x2b9   : > { %v1289_v53 = vld [vmem:[#allocation7 + $0x1e0] sm:$0xff]  ;;  %1366 = vmatpush.msrb.mxu1 %v1287_v60 }
 0x2ba   : > { %2091 = vmatmul.msk.f32.vlgmr.msrb.gmra.mxu3 %vm940_vm1, %v2981_v54  ;;  %1345 = vmatpush.msra.mxu0 %v1289_v53 }
 0x2bb   : > { %1374 = vmatpush.msrb.mxu3 %v1324_v21 }
 0x2bc   : > { %1346 = vmatpush.msra.mxu0 %v1286_v59 }
 0x2bd   : > { %1375 = vmatpush.msrb.mxu3 %v1321_v24  ;;  %v717_v24 = vperm.slane %v2953_v2, 3 }
 0x2bf   : > { %1376 = vmatpush.msrb.mxu3 %v1318_v27  ;;  %v800_v27 = vadd.f32 %v2985_v61, %v717_v24  ;;  %v2667_v61 = vmov 1983009808   ;;  %v1540_v24 = vld [vmem:[#allocation10 + $0xd8] sm:$0xff] }
 0x2c1   : > { %1377 = vmatpush.msrb.mxu3 %v1315_v32 }
 0x2c3   : > { %1378 = vmatpush.msrb.mxu3 %v1312_v36 }
 0x2c5   : > { %1379 = vmatpush.msrb.mxu3 %v1309_v39  ;;  %v959_v39 = vunpack.c.l.s4 %v2667_v61 }
 0x2c7   : > { %1380 = vmatpush.msrb.mxu3 %v1306_v42  ;;  %v3016_v40 = vunpack.c.0.s8 %v959_v39  ;;  %v969_v42 = vunpack.c.l.s4 %v2668_v41  ;;  %v2246_v39 = vld [vmem:[%s3362_s23 + $0x1] ss:$0 sm:$0xff] }
 0x2c9   : > { %1381 = vmatpush.msrb.mxu3 %v1303_v45  ;;  %v3020_v30 = vperm.slane %v2981_v54, %v3016_v40  ;;  %v3022_v31 = vunpack.c.0.s8 %v969_v42  ;;  %v955_v45 = vrot.slane %v2981_v54, 4 }
 0x2cb   : > { %1382 = vmatpush.msrb.mxu3 %v1300_v48  ;;  %v3026_v43 = vperm.slane %v3020_v30, %v3022_v31  ;;  %v957_v47 = vsel %vm956_vm2, 0.0, %v955_v45 }
 0x2cc   : > { %v965_v48 = vperm.slane %v957_v47, %v3016_v40  ;;  %v966_v47 = vrot.slane %v3020_v30, 4 }
 0x2cd   : > { %1383 = vmatpush.msrb.mxu3 %v1297_v49  ;;  %v986_v44 = vrot.slane %v3026_v43, 4 }
 0x2ce   : > { %v3035_v34 = vperm.slane %v965_v48, %v3022_v31  ;;  %v976_v7 = vrot.slane %v965_v48, 4  ;;  %v967_v48 = vsel %vm956_vm2, 0.0, %v966_v47 }
 0x2cf   : > { %1384 = vmatpush.msrb.mxu3 %v1294_v52  ;;  %v987_v46 = vsel %vm956_vm2, 0.0, %v986_v44 }
 0x2d0   : > { %v977_v54 = vsel %vm956_vm2, 0.0, %v976_v7  ;;  %v990_v7 = vrot.slane %v3035_v34, 4 }
 0x2d1   : > { %1385 = vmatpush.msrb.mxu3 %v1291_v56  ;;  %v3046_v51 = vperm.slane %v977_v54, %v3022_v31 }
 0x2d2   : > { %v991_v54 = vsel %vm956_vm2, 0.0, %v990_v7 }
 0x33d   : > { %v1057_v62 = vpop.f32.mrf.mxu3 }
 0x33e   : > { %v2988_v63 = vadd.f32 %v1057_v62, %v2946_v1  ;;  %v1288_v62 = vld [vmem:[#allocation7 + $0x1d8] sm:$0xff] }
 0x33f   : > { %1386 = vmatpush.msrb.mxu3 %v1288_v62 }
 0x340   : > { %1097 = vmatmul.f32.vlgmr.msra.gmra.mxu3 %v2988_v63 }
 0x3c3   : > { %v1098_v3 = vpop.f32.mrf.mxu3 }
 0x3c4   : > { %v1099_v4 = vadd.f32 %v2244_v0, %v1098_v3  ;;  %v1283_v0 = vld [vmem:[#allocation7 + $0x1b0] sm:$0xff]  ;;  %v1284_v3 = vld [vmem:[#allocation7 + $0x1b8] sm:$0xff] }
 0x3c5   : > { %1347 = vmatpush.msra.mxu0 %v1283_v0  ;;  %1367 = vmatpush.msrb.mxu1 %v1284_v3  ;;  %v1544_v3 = vld [vmem:[#allocation10 + $0xf8] sm:$0xff] }
 0x3c6   : > { %1117 = vmatmul.f32.vlgmr.msrb.gmra.mxu0 %v1099_v4  ;;  %v1285_v4 = vld [vmem:[#allocation7 + $0x1c0] sm:$0xff] }
 0x3c7   : > { %1387 = vmatpush.msrb.mxu3 %v1285_v4 }
 0x443   : > { %v1118_v5 = vpop.f32.mrf.mxu0 }
 0x444   : > { %v1121_v6 = vmul.f32 0.17677669, %v1118_v5  ;;  %v1280_v5 = vld [vmem:[#allocation7 + $0x198] sm:$0xff] }
 0x445   : > { %1348 = vmatpush.msra.mxu0 %v1280_v5 }
 0x446   : > { %v1122_v8 = vsel %vm940_vm1, %v1121_v6, -inf }
 0x447   : > { %1123 = vmax.xlane.f32.xlu1 %v1122_v8  ;;  %v1282_v8 = vld [vmem:[#allocation7 + $0x1a8] sm:$0xff] }
 0x448   : > { %1388 = vmatpush.msrb.mxu3 %v1282_v8 }
 0x4ba   : > { %v1124_v9 = vpop.xlane.xlu1 %1123 }
 0x4bb   : > { %v1125_v10 = vsub.f32 %v1121_v6, %v1124_v9  ;;  %v1281_v6 = vld [vmem:[#allocation7 + $0x1a0] sm:$0xff]  ;;  %v1278_v9 = vld [vmem:[#allocation7 + $0x188] sm:$0xff] }
 0x4bc   : > { %1368 = vmatpush.msrb.mxu1 %v1281_v6 }
 0x4bd   : > { %v1126_v11 = vmul.f32 1.442695, %v1125_v10  ;;  %v1279_v10 = vld [vmem:[#allocation7 + $0x190] sm:$0xff] }
 0x4be   : > { %1369 = vmatpush.msrb.mxu1 %v1278_v9  ;;  %1389 = vmatpush.msrb.mxu3 %v1279_v10 }
 0x4bf   : > { %2253 = vpow2.f32 %v1126_v11  ;;  %v2245_v11 = vld [vmem:[%s3363_s18] ss:$0 sm:$0xff] }
 0x4c5   : > { %v2254_v1 = vpop.eup %2253 }
 0x4c6   : > { %v1128_v12 = vsel %vm940_vm1, %v2254_v1, 0.0 }
 0x4c7   : > { %1129 = vadd.xlane.f32.xlu1 %v1128_v12 }
 0x53a   : > { %v1130_v13 = vpop.xlane.xlu1 %1129 }
 0x53b   : > { %2255 = vrcp.f32 %v1130_v13 }
 0x541   : > { %v2256_v14 = vpop.eup %2255 }
 0x542   : > { %v1132_v15 = vmul.f32 %v2256_v14, %v1130_v13 }
 0x544   : > { %v1133_v16 = vsub.f32 2.0, %v1132_v15  ;;  %v1326_v15 = vld [vmem:[#allocation8 + $0x3] sm:$0x7] }
 0x545   : > { %v1330_v23 = vperm.slane %v1326_v15, 2 }
 0x546   : > { %v1134_v17 = vmul.f32 %v2256_v14, %v1133_v16  ;;  %v1329_v16 = vperm.slane %v1326_v15, 1 }
 0x548   : > { %v2996_v18 = vmul.f32 %v2254_v1, %v1134_v17  ;;  %v1328_v17 = vperm.slane %v1326_v15, 0 }
 0x54a   : > { %2092 = vmatmul.msk.f32.vlgmr.msra.gmra.mxu1 %vm940_vm1, %v2996_v18  ;;  %v3042_v49 = vperm.slane %v2996_v18, %v3016_v40  ;;  %v1136_v50 = vrot.slane %v2996_v18, 4 }
 0x54b   : > { %1550 = vmatpush.msra.mxu1 %v1544_v3 }
 0x54c   : > { %v1146_v52 = vrot.slane %v3042_v49, 4  ;;  %v1137_v53 = vsel %vm956_vm2, 0.0, %v1136_v50  ;;  %v3109_v50 = vperm.slane %v3042_v49, %v3022_v31 }
 0x54d   : > { %v3054_v56 = vperm.slane %v1137_v53, %v3016_v40 }
 0x54e   : > { %v1147_v55 = vsel %vm956_vm2, 0.0, %v1146_v52  ;;  %v1166_v52 = vrot.slane %v3109_v50, 4 }
 0x54f   : > { %v3061_v18 = vperm.slane %v3054_v56, %v3022_v31  ;;  %v1156_v53 = vrot.slane %v3054_v56, 4 }
 0x550   : > { %v1167_v30 = vsel %vm956_vm2, 0.0, %v1166_v52 }
 0x5c7   : > { %v1230_v57 = vpop.f32.mrf.mxu1 }
 0x5c8   : > { %v1233_v58 = vadd.f32 %v1230_v57, %v2988_v63  ;;  %v1277_v63 = vld [vmem:[#allocation7 + $0x180] sm:$0xff]  ;;  %v3057_v57 = vperm.slane %v1147_v55, %v3022_v31  ;;  %v1157_v55 = vsel %vm956_vm2, 0.0, %v1156_v53 }
 0x5c9   : > { %1349 = vmatpush.msra.mxu0 %v1277_v63  ;;  %v1719_v53 = vld [vmem:[#allocation13 + $0xf8] sm:$0xff] }
 0x5ca   : > { %1270 = vmatmul.f32.vlgmr.msra.gmra.mxu2 %v1233_v58 }
 0x5cb   : > { %1725 = vmatpush.msra.mxu2 %v1719_v53  ;;  %v1754_v53 = vld [vmem:[#allocation14 + $0x38] sm:$0xff] }
 0x64d   : > { %v1271_v1 = vpop.f32.mrf.mxu2 }
 0x64e   : > { %v1272_v12 = vadd.f32 %v2245_v11, %v1271_v1 }
 0x650   : > { %v1274_v13 = vmax.f32 %v1272_v12, 0.0 }
 0x652   : > { %v3004_v14 = vadd.f32 %v1274_v13, %v1233_v58  ;;  %v1170_v58 = vrot.slane %v3061_v18, 4 }
 0x654   : > { %1350 = vmatmul.f32.vlgmr.msra.gmra.mxu0 %v3004_v14  ;;  %1370 = vmatmul.f32.vlgmr.msrb.gmra.mxu1 %v3004_v14  ;;  %v1171_v59 = vsel %vm956_vm2, 0.0, %v1170_v58 }
 0x655   : > { %1390 = vmatmul.f32.vlgmr.msrb.gmra.mxu3 %v3004_v14 }
 0x6d1   : > { %v1371_v19 = vpop.f32.mrf.mxu1  ;;  %v1351_v20 = vpop.f32.mrf.mxu0 }
 0x6d2   : > { %v1372_v21 = vadd.f32 %v1371_v19, %v1329_v16  ;;  %v1352_v22 = vadd.f32 %v1351_v20, %v1328_v17 }
 0x6d4   : > { %1409 = vmatpush.xpose.msrb.mxu0 %v1372_v21  ;;  %v1543_v21 = vld [vmem:[#allocation10 + $0xf0] sm:$0xff] }
 0x6d5   : > { %1551 = vmatpush.msra.mxu1 %v1543_v21 }
 0x6d7   : > { %1410 = vmatmul.f32.vlgmr.msrb.gmra.mxu0 %v1352_v22  ;;  %v1542_v22 = vld [vmem:[#allocation10 + $0xe8] sm:$0xff] }
 0x6d8   : > { %v1391_v25 = vpop.f32.mrf.mxu3  ;;  %1552 = vmatpush.msra.mxu1 %v1542_v22 }
 0x6d9   : > { %v1392_v26 = vadd.f32 %v1391_v25, %v1330_v23  ;;  %v1541_v23 = vld [vmem:[#allocation10 + $0xe0] sm:$0xff]  ;;  %v1539_v25 = vld [vmem:[#allocation10 + $0xd0] sm:$0xff] }
 0x6da   : > { %1553 = vmatpush.msra.mxu1 %v1541_v23 }
 0x6db   : > { %1522 = vmatpush.msra.mxu0 %v1392_v26  ;;  %v1538_v26 = vld [vmem:[#allocation10 + $0xc8] sm:$0xff] }
 0x6dc   : > { %1554 = vmatpush.msra.mxu1 %v1540_v24 }
 0x6dd   : > { %1697 = vmatpush.msrb.mxu0 %v800_v27  ;;  %v1537_v27 = vld [vmem:[#allocation10 + $0xc0] sm:$0xff] }
 0x6de   : > { %1555 = vmatpush.msra.mxu1 %v1539_v25 }
 0x6e0   : > { %1556 = vmatpush.msra.mxu1 %v1538_v26 }
 0x6e2   : > { %1557 = vmatpush.msra.mxu1 %v1537_v27 }
 0x754   : > { %v1411_v28 = vpop.f32.mrf.mxu0 }
 0x755   : > { %v1414_v29 = vmul.f32 0.17677669, %v1411_v28  ;;  %v1536_v28 = vld [vmem:[#allocation10 + $0xb8] sm:$0xff] }
 0x756   : > { %1558 = vmatpush.msra.mxu1 %v1536_v28 }
 0x757   : > { %v1415_v32 = vsel %vm647_vm0, %v1414_v29, -10000000.0  ;;  %v1535_v29 = vld [vmem:[#allocation10 + $0xb0] sm:$0xff] }
 0x758   : > { %v1416_v33 = vsel %vm940_vm1, %v1415_v32, -inf  ;;  %1559 = vmatpush.msra.mxu1 %v1535_v29 }
 0x759   : > { %1417 = vmax.xlane.f32.xlu2 %v1416_v33  ;;  %v1533_v33 = vld [vmem:[#allocation10 + $0xa0] sm:$0xff] }
 0x7cc   : > { %v1418_v35 = vpop.xlane.xlu2 %1417 }
 0x7cd   : > { %v1419_v36 = vsub.f32 %v1415_v32, %v1418_v35  ;;  %v1534_v32 = vld [vmem:[#allocation10 + $0xa8] sm:$0xff]  ;;  %v1532_v35 = vld [vmem:[#allocation10 + $0x98] sm:$0xff] }
 0x7ce   : > { %1560 = vmatpush.msra.mxu1 %v1534_v32 }
 0x7cf   : > { %v1420_v37 = vmul.f32 1.442695, %v1419_v36  ;;  %v1531_v36 = vld [vmem:[#allocation10 + $0x90] sm:$0xff] }
 0x7d0   : > { %1561 = vmatpush.msra.mxu1 %v1533_v33 }
 0x7d1   : > { %2257 = vpow2.f32 %v1420_v37  ;;  %v1530_v37 = vld [vmem:[#allocation10 + $0x88] sm:$0xff] }
 0x7d2   : > { %1562 = vmatpush.msra.mxu1 %v1532_v35 }
 0x7d4   : > { %1563 = vmatpush.msra.mxu1 %v1531_v36 }
 0x7d6   : > { %1564 = vmatpush.msra.mxu1 %v1530_v37 }
 0x7d7   : > { %v2258_v2 = vpop.eup %2257 }
 0x7d8   : > { %v1422_v38 = vsel %vm940_vm1, %v2258_v2, 0.0 }
 0x7d9   : > { %1423 = vadd.xlane.f32.xlu2 %v1422_v38 }
 0x7f1   : > { %995 = vrot.lane.b32.xlu2 %v987_v46, %s2669_s5 }
 0x7f9   : > { %1007 = vrot.lane.b32.xlu2 %v3035_v34, %s2670_s14  ;;  %v1165_v34 = vperm.slane %v1157_v55, %v3022_v31  ;;  %v1718_v55 = vld [vmem:[#allocation13 + $0xf0] sm:$0xff] }
 0x7fa   : > { %1726 = vmatpush.msra.mxu2 %v1718_v55 }
 0x7fb   : > { %v1172_v58 = vrot.slane %v1165_v34, 4 }
 0x801   : > { %1015 = vrot.lane.b32.xlu2 %v3046_v51, %s2671_s22 }
 0x809   : > { %1179 = vrot.lane.b32.xlu2 %v3057_v57, %s2672_s25 }
 0x811   : > { %1191 = vrot.lane.b32.xlu2 %v1171_v59, %s2673_s8 }
 0x84c   : > { %v1424_v60 = vpop.xlane.xlu2 %1423 }
 0x84d   : > { %2259 = vrcp.f32 %v1424_v60 }
 0x853   : > { %v2260_v62 = vpop.eup %2259 }
 0x854   : > { %v1426_v0 = vmul.f32 %v2260_v62, %v1424_v60  ;;  %v1173_v60 = vsel %vm956_vm2, 0.0, %v1172_v58 }
 0x856   : > { %v1427_v4 = vsub.f32 2.0, %v1426_v0 }
 0x858   : > { %v1428_v5 = vmul.f32 %v2260_v62, %v1427_v4 }
 0x85a   : > { %v1429_v6 = vmul.f32 %v2258_v2, %v1428_v5  ;;  %v1529_v2 = vld [vmem:[#allocation10 + $0x80] sm:$0xff] }
 0x85b   : > { %1565 = vmatpush.msra.mxu1 %v1529_v2 }
 0x85c   : > { %2093 = vmatmul.msk.f32.vlgmr.msra.gmra.mxu0 %vm940_vm1, %v1429_v6  ;;  %v3070_v8 = vperm.slane %v1429_v6, %v3016_v40  ;;  %v1430_v63 = vrot.slane %v1429_v6, 4 }
 0x85e   : > { %v3074_v9 = vperm.slane %v3070_v8, %v3022_v31  ;;  %v1431_v10 = vsel %vm956_vm2, 0.0, %v1430_v63  ;;  %v1440_v49 = vrot.slane %v3070_v8, 4 }
 0x85f   : > { %v1439_v11 = vperm.slane %v1431_v10, %v3016_v40  ;;  %v992_v10 = vrot.slane %v3046_v51, 4  ;;  %v3143_v51 = vpop.permute.xlu2 %995 }
 0x860   : > { %v1460_v1 = vrot.slane %v3074_v9, 4  ;;  %v1441_v59 = vsel %vm956_vm2, 0.0, %v1440_v49 }
 0x861   : > { %v1450_v13 = vrot.slane %v1439_v11, 4  ;;  %v3083_v16 = vperm.slane %v1439_v11, %v3022_v31  ;;  %v1449_v62 = vperm.slane %v1441_v59, %v3022_v31  ;;  %v993_v11 = vsel %vm956_vm2, 0.0, %v992_v10 }
 0x862   : > { %v1461_v12 = vsel %vm956_vm2, 0.0, %v1460_v1  ;;  %v1168_v1 = vrot.slane %v3057_v57, 4 }
 0x863   : > { %1469 = vrot.lane.b32.xlu2 %v1461_v12, %s2669_s5  ;;  %v1451_v15 = vsel %vm956_vm2, 0.0, %v1450_v13  ;;  %v1462_v0 = vrot.slane %v1449_v62, 4  ;;  %v1464_v13 = vrot.slane %v3083_v16, 4 }
 0x864   : > { %v3086_v17 = vperm.slane %v1451_v15, %v3022_v31  ;;  %v1169_v12 = vsel %vm956_vm2, 0.0, %v1168_v1 }
 0x865   : > { %v1463_v56 = vsel %vm956_vm2, 0.0, %v1462_v0  ;;  %v1465_v15 = vsel %vm956_vm2, 0.0, %v1464_v13 }
 0x866   : > { %v1466_v19 = vrot.slane %v3086_v17, 4 }
 0x868   : > { %v1467_v20 = vsel %vm956_vm2, 0.0, %v1466_v19 }
 0x86b   : > { %1481 = vrot.lane.b32.xlu2 %v3083_v16, %s2670_s14 }
 0x873   : > { %1493 = vrot.lane.b32.xlu2 %v1467_v20, %s2674_s17  ;;  %v3147_v20 = vpop.permute.xlu2 %1007 }
 0x87b   : > { %v3153_v27 = vpop.permute.xlu2 %1015 }
 0x883   : > { %v1180_v47 = vpop.permute.xlu2 %1179 }
 0x8d9   : > { %v1524_v38 = vpop.f32.mrf.mxu0 }
 0x8da   : > { %v3094_v61 = vadd.f32 %v1524_v38, %v3004_v14  ;;  %v975_v14 = vperm.slane %v967_v48, %v3022_v31 }
 0x8dc   : > { %1566 = vmatmul.f32.vlgmr.msra.gmra.mxu1 %v3094_v61  ;;  %v988_v8 = vrot.slane %v975_v14, 4 }
 0x8de   : > { %v989_v63 = vsel %vm956_vm2, 0.0, %v988_v8 }
 0x959   : > { %v1567_v41 = vpop.f32.mrf.mxu1 }
 0x95a   : > { %v1568_v42 = vadd.f32 %v2246_v39, %v1567_v41 }
 0x95c   : > { %1586 = vmatmul.f32.vlgmr.msrb.gmra.mxu2 %v1568_v42 }
 0x9df   : > { %v1587_v44 = vpop.f32.mrf.mxu2 }
 0x9e0   : > { %v1590_v45 = vmul.f32 0.17677669, %v1587_v44 }
 0x9e2   : > { %v1591_v46 = vsel %vm940_vm1, %v1590_v45, -inf }
 0x9e3   : > { %1592 = vmax.xlane.f32.xlu0 %v1591_v46 }
 0x9f7   : > { %999 = vrot.lane.b32.xlu0 %v975_v14, %s2672_s25 }
 0x9ff   : > { %1011 = vrot.lane.b32.xlu0 %v991_v54, %s2673_s8 }
 0xa07   : > { %1175 = vrot.lane.b32.xlu0 %v1167_v30, %s2669_s5 }
 0xa0f   : > { %1187 = vrot.lane.b32.xlu0 %v3061_v18, %s2670_s14 }
 0xa17   : > { %1199 = vrot.lane.b32.xlu0 %v1173_v60, %s2674_s17 }
 0xa1f   : > { %1477 = vrot.lane.b32.xlu0 %v1463_v56, %s2675_s9 }
 0xa27   : > { %1489 = vrot.lane.b32.xlu0 %v3086_v17, %s2671_s22 }
 0xa56   : > { %v1593_v18 = vpop.xlane.xlu0 %1592 }
 0xa57   : > { %v1594_v3 = vsub.f32 %v1590_v45, %v1593_v18 }
 0xa59   : > { %v1595_v4 = vmul.f32 1.442695, %v1594_v3  ;;  %v1022_v3 = vsel %vm940_vm1, %v3026_v43, %v3143_v51 }
 0xa5b   : > { %2261 = vpow2.f32 %v1595_v4 }
 0xa61   : > { %v2262_v5 = vpop.eup %2261 }
 0xa62   : > { %v1597_v6 = vsel %vm940_vm1, %v2262_v5, 0.0 }
 0xa63   : > { %1598 = vadd.xlane.f32.xlu1 %v1597_v6 }
 0xa69   : > { %v3145_v19 = vpop.permute.xlu0 %999 }
 0xa6a   : > { %v1024_v6 = vsel %vm1023_vm3, %v1022_v3, %v3145_v19 }
 0xa71   : > { %v3149_v25 = vpop.permute.xlu0 %1011 }
 0xa79   : > { %v1176_v44 = vpop.permute.xlu0 %1175 }
 0xa7a   : > { %v1202_v30 = vsel %vm940_vm1, %v3109_v50, %v1176_v44  ;;  %v1762_v44 = vld [vmem:[#allocation14 + $0x78] sm:$0xff] }
 0xa7b   : > { %1767 = vmatpush.msra.mxu3 %v1762_v44 }
 0xa7c   : > { %1003 = vrot.lane.b32.xlu1 %v989_v63, %s2675_s9 }
 0xa81   : > { %v1188_v52 = vpop.permute.xlu0 %1187 }
 0xa84   : > { %1019 = vrot.lane.b32.xlu1 %v993_v11, %s2674_s17 }
 0xa89   : > { %v3181_v60 = vpop.permute.xlu0 %1199 }
 0xa8c   : > { %1183 = vrot.lane.b32.xlu1 %v1169_v12, %s2675_s9 }
 0xa91   : > { %v1478_v4 = vpop.permute.xlu0 %1477 }
 0xa94   : > { %1195 = vrot.lane.b32.xlu1 %v1165_v34, %s2671_s22  ;;  %v1192_v34 = vpop.permute.xlu2 %1191 }
 0xa99   : > { %v1490_v51 = vpop.permute.xlu0 %1489 }
 0xa9c   : > { %1473 = vrot.lane.b32.xlu1 %v1449_v62, %s2672_s25  ;;  %v1470_v62 = vpop.permute.xlu2 %1469 }
 0xa9d   : > { %v1496_v63 = vsel %vm940_vm1, %v3074_v9, %v1470_v62 }
 0xaa4   : > { %1485 = vrot.lane.b32.xlu1 %v1465_v15, %s2673_s8 }
 0xad6   : > { %v1599_v17 = vpop.xlane.xlu1 %1598 }
 0xad7   : > { %2263 = vrcp.f32 %v1599_v17 }
 0xadd   : > { %v2264_v57 = vpop.eup %2263 }
 0xade   : > { %v1601_v21 = vmul.f32 %v2264_v57, %v1599_v17 }
 0xae0   : > { %v1602_v22 = vsub.f32 2.0, %v1601_v21 }
 0xae2   : > { %v1603_v23 = vmul.f32 %v2264_v57, %v1602_v22 }
 0xae4   : > { %v1604_v24 = vmul.f32 %v2262_v5, %v1603_v23  ;;  %v1482_v5 = vpop.permute.xlu2 %1481 }
 0xae6   : > { %2095 = vmatmul.msk.f32.vlgmr.msrb.gmra.mxu0 %vm940_vm1, %v1604_v24  ;;  %v1610_v16 = vperm.slane %v1604_v24, %v3016_v40  ;;  %v1605_v26 = vrot.slane %v1604_v24, 4 }
 0xae8   : > { %v1615_v28 = vrot.slane %v1610_v16, 4  ;;  %v3156_v29 = vperm.slane %v1610_v16, %v3022_v31  ;;  %v1606_v32 = vsel %vm956_vm2, 0.0, %v1605_v26  ;;  %v1717_v16 = vld [vmem:[#allocation13 + $0xe8] sm:$0xff]  ;;  %v1716_v26 = vld [vmem:[#allocation13 + $0xe0] sm:$0xff] }
 0xae9   : > { %v1614_v33 = vperm.slane %v1606_v32, %v3016_v40  ;;  %1727 = vmatpush.msra.mxu2 %v1717_v16  ;;  %v1713_v32 = vld [vmem:[#allocation13 + $0xc8] sm:$0xff] }
 0xaea   : > { %v1616_v35 = vsel %vm956_vm2, 0.0, %v1615_v28  ;;  %v1635_v36 = vrot.slane %v3156_v29, 4  ;;  %v1714_v28 = vld [vmem:[#allocation13 + $0xd0] sm:$0xff] }
 0xaeb   : > { %v1624_v37 = vperm.slane %v1616_v35, %v3022_v31  ;;  %v1630_v38 = vperm.slane %v1614_v33, %v3022_v31  ;;  %v1625_v41 = vrot.slane %v1614_v33, 4  ;;  %1728 = vmatpush.msra.mxu2 %v1716_v26  ;;  %v1712_v33 = vld [vmem:[#allocation13 + $0xc0] sm:$0xff]  ;;  %v1711_v35 = vld [vmem:[#allocation13 + $0xb8] sm:$0xff] }
 0xaec   : > { %v1636_v2 = vsel %vm956_vm2, 0.0, %v1635_v36  ;;  %v1494_v17 = vpop.permute.xlu2 %1493  ;;  %v1710_v36 = vld [vmem:[#allocation13 + $0xb0] sm:$0xff] }
 0xaed   : > { %1648 = vrot.lane.b32.xlu0 %v1624_v37, %s2672_s25  ;;  %1644 = vrot.lane.b32.xlu1 %v1636_v2, %s2669_s5  ;;  %v1637_v39 = vrot.slane %v1624_v37, 4  ;;  %v1639_v45 = vrot.slane %v1630_v38, 4  ;;  %v1626_v46 = vsel %vm956_vm2, 0.0, %v1625_v41  ;;  %v1709_v37 = vld [vmem:[#allocation13 + $0xa8] sm:$0xff]  ;;  %v1708_v2 = vld [vmem:[#allocation13 + $0xa0] sm:$0xff] }
 0xaee   : > { %v1004_v42 = vpop.permute.xlu1 %1003  ;;  %v1634_v14 = vperm.slane %v1626_v46, %v3022_v31  ;;  %v1203_v31 = vsel %vm1023_vm3, %v1202_v30, %v1180_v47  ;;  %v1705_v41 = vld [vmem:[#allocation13 + $0x88] sm:$0xff]  ;;  %v1759_v46 = vld [vmem:[#allocation14 + $0x60] sm:$0xff]  ;;  %v1758_v47 = vld [vmem:[#allocation14 + $0x58] sm:$0xff] }
 0xaef   : > { %v1638_v40 = vsel %vm956_vm2, 0.0, %v1637_v39  ;;  %v1640_v48 = vsel %vm956_vm2, 0.0, %v1639_v45  ;;  %v1026_v10 = vsel %vm1025_vm4, %v1024_v6, %v1004_v42  ;;  %v1706_v39 = vld [vmem:[#allocation13 + $0x90] sm:$0xff]  ;;  %v1704_v42 = vld [vmem:[#allocation13 + $0x80] sm:$0xff]  ;;  %v1760_v45 = vld [vmem:[#allocation14 + $0x68] sm:$0xff] }
 0xaf0   : > { %1652 = vrot.lane.b32.xlu2 %v1638_v40, %s2675_s9  ;;  %v1641_v54 = vrot.slane %v1634_v14, 4  ;;  %v1028_v1 = vsel %vm1027_vm5, %v1026_v10, %v3147_v20  ;;  %v1761_v40 = vld [vmem:[#allocation14 + $0x70] sm:$0xff]  ;;  %s3365_s9 = sld [smem:[#allocation42_spill]] }
 0xaf1   : > { %v1030_v43 = vsel %vm1029_vm6, %v1028_v1, %v3149_v25  ;;  %1768 = vmatpush.msra.mxu3 %v1761_v40 }
 0xaf2   : > { %v1642_v49 = vsel %vm956_vm2, 0.0, %v1641_v54  ;;  %v1032_v19 = vsel %vm1031_vm7, %v1030_v43, %v3153_v27  ;;  %v1715_v27 = vld [vmem:[#allocation13 + $0xd8] sm:$0xff]  ;;  %v1749_v43 = vld [vmem:[#allocation14 + $0x10] sm:$0xff] }
 0xaf3   : > { %1729 = vmatpush.msra.mxu2 %v1715_v27  ;;  %1769 = vmatpush.msra.mxu3 %v1760_v45 }
 0xaf5   : > { %1660 = vrot.lane.b32.xlu0 %v1640_v48, %s2673_s8  ;;  %1656 = vrot.lane.b32.xlu1 %v1630_v38, %s2670_s14  ;;  %v1707_v38 = vld [vmem:[#allocation13 + $0x98] sm:$0xff]  ;;  %v1757_v48 = vld [vmem:[#allocation14 + $0x50] sm:$0xff]  ;;  %s1836_s8 = sshll.u32 %s633_s19, 4  ;;  %s1837_s8 = int_to_ptr.vmem [resolvable:$true] %s1836_s8 }
 0xaf6   : > { %v1020_v7 = vpop.permute.xlu1 %1019  ;;  %1730 = vmatpush.msra.mxu2 %v1714_v28  ;;  %1770 = vmatpush.msra.mxu3 %v1759_v46  ;;  %s1848_s27 = scalar_lea.hbm %s3365_s9, %s2101_s12 }
 0xaf7   : > { %v1034_v20 = vsel %vm1033_vm8, %v1032_v19, %v1020_v7 }
 0xaf8   : > { %1664 = vrot.lane.b32.xlu2 %v1634_v14, %s2671_s22  ;;  %v1036_v24 = vsel %vm1035_vm9, %v1034_v20, 0.0  ;;  %1731 = vmatpush.msra.mxu2 %v1713_v32  ;;  %v1756_v14 = vld [vmem:[#allocation14 + $0x48] sm:$0xff]  ;;  %s3364_s22 = sld [smem:[#allocation41_spill]] }
 0xaf9   : > { %1771 = vmatpush.msra.mxu3 %v1758_v47 }
 0xafa   : > { %1732 = vmatpush.msra.mxu2 %v1712_v33 }
 0xafb   : > { %1772 = vmatpush.msra.mxu3 %v1757_v48 }
 0xafc   : > { %1733 = vmatpush.msra.mxu2 %v1711_v35 }
 0xafd   : > { %1668 = vrot.lane.b32.xlu1 %v1642_v49, %s2674_s17  ;;  %1773 = vmatpush.msra.mxu3 %v1756_v14 }
 0xafe   : > { %v1184_v58 = vpop.permute.xlu1 %1183  ;;  %1734 = vmatpush.msra.mxu2 %v1710_v36  ;;  %s1834_s25 = scalar_lea.hbm %s3364_s22, %s2101_s12 }
 0xaff   : > { %v1204_v59 = vsel %vm1025_vm4, %v1203_v31, %v1184_v58  ;;  %v1753_v31 = vld [vmem:[#allocation14 + $0x30] sm:$0xff]  ;;  %s1838_s17 = sshll.u32 %s1834_s25, 4  ;;  %s1839_s17 = int_to_ptr.hbm [resolvable:$true] %s1838_s17 }
 0xb00   : > { %v1205_v50 = vsel %vm1027_vm5, %v1204_v59, %v1188_v52  ;;  %1735 = vmatpush.msra.mxu2 %v1709_v37  ;;  %v1755_v52 = vld [vmem:[#allocation14 + $0x40] sm:$0xff]  ;;  %v1752_v59 = vld [vmem:[#allocation14 + $0x28] sm:$0xff]  ;;  %s2519_s3 = sshra.s32 %s1839_s17, 4  ;;  %s2520_s3 = int_to_ptr.hbm [resolvable:$true] %s2519_s3 }
 0xb01   : > { %v1206_v0 = vsel %vm1029_vm6, %v1205_v50, %v1192_v34  ;;  %1774 = vmatpush.msra.mxu3 %v1755_v52  ;;  %s2521_s0 = scalar_lea.hbm %s2520_s3, 2  ;;  %p2526_p7 = scmp.lt.s32.totalorder %s2520_s3, %s3364_s22 }
 0xb02   : > { %1736 = vmatpush.msra.mxu2 %v1708_v2  ;;  %p2522_p1 = scmp.ne.s32.totalorder %s2520_s3, %s2521_s0 }
 0xb03   : > { %1775 = vmatpush.msra.mxu3 %v1754_v53 }
 0xb04   : > { %1737 = vmatpush.msra.mxu2 %v1707_v38  ;;  %p2523_p3 = pnand %p2522_p1, %p2850_p4 }
 0xb05   : > { %1776 = vmatpush.msra.mxu3 %v1753_v31 }
 0xb06   : > { %v1196_v56 = vpop.permute.xlu1 %1195  ;;  %1738 = vmatpush.msra.mxu2 %v1706_v39  ;;  %p2524_p12 = pneg %p2523_p3 }
 0xb07   : > { %v3186_v18 = vsel %vm1031_vm7, %v1206_v0, %v1196_v56  ;;  %v1751_v0 = vld [vmem:[#allocation14 + $0x20] sm:$0xff]  ;;  %1777 = vmatpush.msra.mxu3 %v1752_v59 }
 0xb08   : > { %1739 = vmatpush.msra.mxu2 %v1705_v41  ;;  %v1208_v6 = vsel %vm1033_vm8, %v3186_v18, %v3181_v60  ;;  %v1747_v60 = vld [vmem:[#allocation14] sm:$0xff]  ;;  %v2247_v18 = vld [vmem:[%s3363_s18 + $0x1] ss:$0 sm:$0xff] }
 0xb09   : > { %1778 = vmatpush.msra.mxu3 %v1751_v0 }
 0xb0a   : > { %1740 = vmatpush.msra.mxu2 %v1704_v42 }
 0xb0e   : > { %v1474_v8 = vpop.permute.xlu1 %1473 }
 0xb0f   : > { %v1497_v11 = vsel %vm1023_vm3, %v1496_v63, %v1474_v8 }
 0xb10   : > { %v1498_v12 = vsel %vm1025_vm4, %v1497_v11, %v1478_v4  ;;  %v1209_v11 = vsel %vm1035_vm9, %v1208_v6, 0.0 }
 0xb11   : > { %v1499_v13 = vsel %vm1027_vm5, %v1498_v12, %v1482_v5  ;;  %v1750_v12 = vld [vmem:[#allocation14 + $0x18] sm:$0xff] }
 0xb12   : > { %1779 = vmatpush.msra.mxu3 %v1750_v12 }
 0xb14   : > { %1780 = vmatpush.msra.mxu3 %v1749_v43 }
 0xb16   : > { %v1486_v15 = vpop.permute.xlu1 %1485 }
 0xb17   : > { %v1500_v9 = vsel %vm1029_vm6, %v1499_v13, %v1486_v15  ;;  %v1748_v13 = vld [vmem:[#allocation14 + $0x8] sm:$0xff] }
 0xb18   : > { %v1501_v57 = vsel %vm1031_vm7, %v1500_v9, %v1490_v51  ;;  %1781 = vmatpush.msra.mxu3 %v1748_v13 }
 0xb19   : > { %v1502_v21 = vsel %vm1033_vm8, %v1501_v57, %v1494_v17 }
 0xb1a   : > { %v1503_v22 = vsel %vm1035_vm9, %v1502_v21, 0.0  ;;  %1782 = vmatpush.msra.mxu3 %v1747_v60 }
 0xb1b   : > { %v1795_v23 = vrot.slane %v1503_v22, 7 }
 0xb1d   : > { %v1797_v25 = vsel %vm1791_vm10, %v1036_v24, %v1795_v23 }
 0xb1e   : > { %1798 = vst [vmem:[%s3215_s24] sm:$0x3] %v1797_v25 }
 0xb4a   : > { %v1653_v34 = vpop.permute.xlu2 %1652 }
 0xb5f   : > { %v1649_v7 = vpop.permute.xlu0 %1648  ;;  %v1645_v54 = vpop.permute.xlu1 %1644 }
 0xb60   : > { %v1671_v30 = vsel %vm940_vm1, %v3156_v29, %v1645_v54 }
 0xb61   : > { %v1672_v58 = vsel %vm1023_vm3, %v1671_v30, %v1649_v7 }
 0xb62   : > { %v1673_v62 = vsel %vm1025_vm4, %v1672_v58, %v1653_v34 }
 0xb63   : > { %v1699_v55 = vpop.f32.mrf.mxu0 }
 0xb64   : > { %v1702_v49 = vadd.f32 %v1699_v55, %v3094_v61  ;;  %v1665_v61 = vpop.permute.xlu2 %1664 }
 0xb66   : > { %1741 = vmatmul.f32.vlgmr.msra.gmra.mxu2 %v1702_v49 }
 0xb67   : > { %v1657_v50 = vpop.permute.xlu1 %1656  ;;  %v1661_v56 = vpop.permute.xlu0 %1660 }
 0xb68   : > { %v1674_v29 = vsel %vm1027_vm5, %v1673_v62, %v1657_v50 }
 0xb69   : > { %v1675_v3 = vsel %vm1029_vm6, %v1674_v29, %v1661_v56 }
 0xb6a   : > { %v1676_v4 = vsel %vm1031_vm7, %v1675_v3, %v1665_v61 }
 0xb6f   : > { %v1669_v5 = vpop.permute.xlu1 %1668 }
 0xb70   : > { %v1677_v8 = vsel %vm1033_vm8, %v1676_v4, %v1669_v5 }
 0xb71   : > { %v1678_v63 = vsel %vm1035_vm9, %v1677_v8, 0.0 }
 0xb72   : > { %v1789_v10 = vrot.slane %v1678_v63, 7 }
 0xb74   : > { %v1792_v1 = vsel %vm1791_vm10, %v1209_v11, %v1789_v10 }
 0xb75   : > { %1793 = vst [vmem:[%s633_s19] sm:$0x3] %v1792_v1  ;;  %s2525_s19 = scalar_lea.hbm %s3364_s22, 4 }
 0xb76   : > { %p2527_p9 = scmp.lt.s32.totalorder %s2525_s19, %s2521_s0 }
 0xb78   : > { %p2528_p8 = por %p2527_p9, %p2526_p7 }
 0xb7a   : > { %p2529_p10 = pnand %p2528_p8, %p2524_p12 }
 0xbe9   : > { %v1742_v15 = vpop.f32.mrf.mxu2 }
 0xbea   : > { %v1743_v51 = vadd.f32 %v2247_v18, %v1742_v15 }
 0xbec   : > { %v1745_v9 = vmax.f32 %v1743_v51, 0.0 }
 0xbee   : > { %v1746_v17 = vadd.f32 %v1745_v9, %v1702_v49 }
 0xbf0   : > { %1783 = vmatmul.f32.vlgmr.msra.gmra.mxu3 %v1746_v17 }
 0xbf1   : > { %2532 = shalt.err (!%p2529_p10)
}
 0xbf2   : > { %2134 = dma.vmem_to_hbm [thread:$0]  (%p2850_p4), %s1837_s8, 32, %s1839_s17, %s3247_s2  }
 0xbf3   : > { %s1852_s10 = sshll.u32 %s1848_s27, 4  ;;  %s1850_s12 = sshll.u32 %s3215_s24, 4  ;;  %s1851_s12 = int_to_ptr.vmem [resolvable:$true] %s1850_s12  ;;  %s1853_s10 = int_to_ptr.hbm [resolvable:$true] %s1852_s10 }
 0xbf4   : > { %s2547_s11 = sshra.s32 %s1853_s10, 4  ;;  %s2553_s3 = scalar_lea.hbm %s3365_s9, 4  ;;  %s2548_s11 = int_to_ptr.hbm [resolvable:$true] %s2547_s11 }
 0xbf5   : > { %s2549_s21 = scalar_lea.hbm %s2548_s11, 2  ;;  %p2554_p0 = scmp.lt.s32.totalorder %s2548_s11, %s3365_s9 }
 0xbf6   : > { %p2550_p11 = scmp.ne.s32.totalorder %s2548_s11, %s2549_s21  ;;  %p2555_p2 = scmp.lt.s32.totalorder %s2553_s3, %s2549_s21 }
 0xbf8   : > { %p2551_p5 = pnand %p2550_p11, %p2850_p4  ;;  %p2556_p1 = por %p2555_p2, %p2554_p0 }
 0xbfa   : > { %p2552_p13 = pneg %p2551_p5 }
 0xbfc   : > { %p2557_p3 = pnand %p2556_p1, %p2552_p13 }
 0xbfe   : > { %2560 = shalt.err (!%p2557_p3)
}
 0xbff   : > { %2135 = dma.vmem_to_hbm [thread:$0]  (%p2850_p4), %s1851_s12, 32, %s1853_s10, %s3247_s2  }
 0xc00   : > { %s2100_s24 = sshll.u32 %s2775_s20, 3  ;;  %s3366_s27 = sld [smem:[#allocation40_spill]] }
 0xc01   : > { %s3367_s11 = sld [smem:[#allocation39_spill]]  ;;  %s626_s21 = scalar_lea.vmem [#allocation16], %s2906_s6 }
 0xc02   : > { %s1822_s1 = sshll.u32 %s626_s21, 4  ;;  %s1800_s5 = scalar_lea.sflag [#allocation4], %s2903_s4  ;;  %s1823_s1 = int_to_ptr.vmem [resolvable:$true] %s1822_s1 }
 0xc06   : > { %s1820_s19 = scalar_lea.hbm %s3366_s27, %s2100_s24  ;;  %s2581_s14 = scalar_lea.hbm %s3366_s27, 16 }
 0xc07   : > { %v2248_v19 = vld [vmem:[%s3367_s11] ss:$0 sm:$0xff]  ;;  %s1824_s3 = sshll.u32 %s1820_s19, 4  ;;  %s1825_s3 = int_to_ptr.hbm [resolvable:$true] %s1824_s3 }
 0xc08   : > { %s2575_s2 = sshra.s32 %s1825_s3, 4  ;;  %s2576_s2 = int_to_ptr.hbm [resolvable:$true] %s2575_s2 }
 0xc09   : > { %s2577_s20 = scalar_lea.hbm %s2576_s2, 8  ;;  %p2582_p8 = scmp.lt.s32.totalorder %s2576_s2, %s3366_s27 }
 0xc0a   : > { %p2578_p12 = scmp.ne.s32.totalorder %s2576_s2, %s2577_s20  ;;  %p2583_p10 = scmp.lt.s32.totalorder %s2581_s14, %s2577_s20 }
 0xc0c   : > { %p2579_p7 = pnand %p2578_p12, %p2850_p4  ;;  %p2584_p11 = por %p2583_p10, %p2582_p8 }
 0xc0e   : > { %p2580_p9 = pneg %p2579_p7 }
 0xc10   : > { %p2585_p5 = pnand %p2584_p11, %p2580_p9 }
 0xc73   : > { %v1784_v57 = vpop.f32.mrf.mxu3 }
 0xc74   : > { %v1785_v20 = vadd.f32 %v2248_v19, %v1784_v57 }
 0xc76   : > { %1787 = vst [vmem:[%s626_s21] sm:$0xff] %v1785_v20 }
 0xc77   : > { %2588 = shalt.err (!%p2585_p5)
}
 0xc78   : > { %2133 = dma.vmem_to_hbm [thread:$0]  (%p2850_p4), %s1823_s1, 128, %s1825_s3, %s1800_s5  }
 0xc79 PF: > { %s1864_s4 = sand.u32 1, %s2639_s29   ;;  %p3368_p13 = scmp.ge.s32.totalorder %s2651_s16, 2 }
 0xc7a   : > { %s1865_s8 = scalar_lea.sflag [#allocation4], %s1864_s4 }
 0xc7b   : > { %p2166_p0 = pnand %p3368_p13, %p2854_p6 }
 0xc7d   : > { %p2167_p2 = pneg %p2166_p0 }
 0xc7f   : > { %2630 = dma.done.wait (%p2167_p2), %s1865_s8, 128  }
 0xc80   : > { %2632 = vsyncadd (%p2167_p2), %s1865_s8, 4294967168  ;;  %s3369_s17 = sadd.s32 4294967294, %s2651_s16  }
 0xc81   : > { %s1874_s19 = sand.u32 1, %s3369_s17  }
 0xc82   : > { %s1875_s25 = scalar_lea.sflag [#allocation18], %s1874_s19 }
 0xc83   : > { %2634 = dma.done.wait (%p2167_p2), %s1875_s25, 64  }
 0xc84   : > { %2636 = vsyncadd (%p2167_p2), %s1875_s25, 4294967232  ;;  %s3370_s26 = sld [smem:[#allocation28_spill]]  ;;  %p37_p4 = scmp.ge.s32.totalorder %s2822_s28, 4  }
 0xc85   : > { %s3371_s29 = smov %s2643_s30  ;;  %s3372_s30 = smov %s2647_s15 }
 0xc86   : > { %s3374_s16 = smov %s2822_s28  ;;  %39 = sbr.rel (!%p37_p4) target bundleno = 27 (0x1b), region = 188 }
 0xc8a   : > { %s3373_s15 = smov %s3370_s26 }
 0xc8b   :  { %1891 = vsyncpa [#allocation3], 1 }
 0xc8c   :  { %1893 = vsyncpa [#allocation3 + $0x1], 1 }
 0xc8d   :  { %1894 = vsyncpa [#allocation6], 1 }
 0xc8e   :  { %1896 = vsyncpa [#allocation6 + $0x1], 1 }
 0xc8f   :  { %1897 = vsyncpa [#allocation9], 1 }
 0xc90   :  { %1898 = vsyncpa [#allocation12], 1 }
 0xc91   :  { %1899 = vsyncpa [#allocation15], 1 }
 0xc92   :  { %1900 = vsyncpa [#allocation4], 1 }
 0xc93   :  { %1902 = vsyncpa [#allocation4 + $0x1], 1 }
 0xc94   :  { %1903 = vsyncpa [#allocation18], 1 }
 0xc95   :  { %1905 = vsyncpa [#allocation18 + $0x1], 1 }

</bundles_post_ra>
